<compile_context>
chip_gen: v5e
topology: v5e:2x2
jax: 0.10.0
libtpu: 0.0.40
codegen_flags: <defaults>
</compile_context>

<pallas_src>
import functools

import jax
import jax.numpy as jnp
from jax import lax
from jax.experimental import pallas as pl
from jax.experimental.pallas import tpu as pltpu


def gru_tagger_kernel(tokens_ref, w_ihT_ref, b_x_ref, w_hhT_ref, b_hn_ref,
                      w_outT_ref, b_out_ref, out_ref, xproj_ref, hall_ref,
                      *, num_tags):
    """
    tokens_ref : SMEM int32 [T]        token ids
    w_ihT_ref  : VMEM f32 [V, 3*HP]    gate-padded, transposed input weights
    b_x_ref    : VMEM f32 [1, 3*HP]    b_ih with b_hh(r,z) folded in
    w_hhT_ref  : VMEM f32 [HP, 3*HP]   gate-padded, transposed hidden weights
    b_hn_ref   : VMEM f32 [1, HP]      b_hh n-gate part
    w_outT_ref : VMEM f32 [HP, CP]     padded, transposed output weights
    b_out_ref  : VMEM f32 [1, CP]
    out_ref    : VMEM f32 [T, CP]      log-softmax scores (lane-padded)
    xproj_ref  : VMEM f32 [T, 3*HP]    scratch: gathered input projections
    hall_ref   : VMEM f32 [T, HP]      scratch: all hidden states
    """
    T, CP = out_ref.shape
    HP = hall_ref.shape[1]

    # --- Phase 1: token-indexed row gather (replaces one-hot @ W_ih^T) --------
    b_x = b_x_ref[...]

    def gather_row(t, carry):
        tok = tokens_ref[t]
        xproj_ref[pl.ds(t, 1), :] = w_ihT_ref[pl.ds(tok, 1), :] + b_x
        return carry

    lax.fori_loop(0, T, gather_row, 0, unroll=True)

    # --- Phase 2: sequential GRU recurrence (PyTorch gate order r, z, n) ------
    #   r = sigmoid(Wir x + bir + Whr h + bhr)          (bhr folded into xproj)
    #   z = sigmoid(Wiz x + biz + Whz h + bhz)          (bhz folded into xproj)
    #   n = tanh  (Win x + bin + r * (Whn h + bhn))
    #   h = (1-z)*n + z*h  ==  n + z*(h - n)
    w_hh = w_hhT_ref[...]          # hoisted: loop-invariant
    b_hn = b_hn_ref[...]

    def step(t, h):
        hp = jnp.dot(h, w_hh, preferred_element_type=jnp.float32)   # [1, 3HP]
        xp = xproj_ref[pl.ds(t, 1), :]                               # [1, 3HP]
        r = jax.nn.sigmoid(xp[:, 0:HP] + hp[:, 0:HP])
        z = jax.nn.sigmoid(xp[:, HP:2 * HP] + hp[:, HP:2 * HP])
        n = jnp.tanh(xp[:, 2 * HP:3 * HP] + r * (hp[:, 2 * HP:3 * HP] + b_hn))
        h_new = n + z * (h - n)
        hall_ref[pl.ds(t, 1), :] = h_new        # [1, 128]: lane-dense store
        return h_new

    h0 = jnp.zeros((1, HP), dtype=jnp.float32)  # init_hidden(): zeros
    lax.fori_loop(0, T, step, h0, unroll=True)

    # --- Phase 3: hidden2tag + log_softmax over the real tag lanes ------------
    tag_space = (jnp.dot(hall_ref[...], w_outT_ref[...],
                         preferred_element_type=jnp.float32) + b_out_ref[...])
    lane = lax.broadcasted_iota(jnp.int32, (T, CP), 1)
    valid = lane < num_tags
    masked = jnp.where(valid, tag_space, jnp.float32(-1e30))
    m = jnp.max(masked, axis=-1, keepdims=True)
    s = jnp.sum(jnp.where(valid, jnp.exp(tag_space - m), 0.0),
                axis=-1, keepdims=True)
    out_ref[...] = tag_space - (m + jnp.log(s))


def _round_up(x, m):
    return (x + m - 1) // m * m


def _prep_weights(params, hidden_dim, tagset_size, hp, cp):
    """Gate-pad + transpose weights so every gate block / tag row is 128-lane dense."""
    H, C = hidden_dim, tagset_size
    w_ih, w_hh = params["w_ih"], params["w_hh"]       # [3H, V], [3H, H]
    b_ih, b_hh = params["b_ih"], params["b_hh"]       # [3H], [3H]
    w_out, b_out = params["w_out"], params["b_out"]   # [C, H], [C]
    V = w_ih.shape[1]

    def gate_pad_T(w, rows):
        out = jnp.zeros((rows, 3 * hp), jnp.float32)
        for g in range(3):
            blk = w[g * H:(g + 1) * H, :].T            # [in_dim, H]
            out = out.at[:blk.shape[0], g * hp:g * hp + H].set(blk)
        return out

    w_ihT_p = gate_pad_T(w_ih, V)                      # [V, 3*HP]
    w_hhT_p = gate_pad_T(w_hh, hp)                     # [HP, 3*HP]

    b_x = jnp.zeros((1, 3 * hp), jnp.float32)
    b_x = b_x.at[0, 0 * hp:0 * hp + H].set(b_ih[0:H] + b_hh[0:H])          # r
    b_x = b_x.at[0, 1 * hp:1 * hp + H].set(b_ih[H:2 * H] + b_hh[H:2 * H])  # z
    b_x = b_x.at[0, 2 * hp:2 * hp + H].set(b_ih[2 * H:3 * H])              # n
    b_hn = jnp.zeros((1, hp), jnp.float32).at[0, :H].set(b_hh[2 * H:3 * H])

    w_outT_p = jnp.zeros((hp, cp), jnp.float32).at[:H, :C].set(w_out.T)
    b_out_p = jnp.zeros((1, cp), jnp.float32).at[0, :C].set(b_out)
    return w_ihT_p, b_x, w_hhT_p, b_hn, w_outT_p, b_out_p


def gru_tagger_forward(tokens, params, vocab_size):
    """tokens: int32 [T]. Returns tag_scores [T, C] (log-probs)."""
    del vocab_size  # one-hot never materialized; V comes from the weight shape
    T = tokens.shape[0]
    H = params["w_hh"].shape[1]
    C = params["w_out"].shape[0]
    HP = _round_up(max(H, 128), 128)
    CP = _round_up(max(C, 128), 128)

    w_ihT_p, b_x, w_hhT_p, b_hn, w_outT_p, b_out_p = _prep_weights(
        params, H, C, HP, CP)

    smem = pl.BlockSpec(memory_space=pltpu.MemorySpace.SMEM)
    vmem = pl.BlockSpec(memory_space=pltpu.MemorySpace.VMEM)
    out_padded = pl.pallas_call(
        functools.partial(gru_tagger_kernel, num_tags=C),
        out_shape=jax.ShapeDtypeStruct((T, CP), jnp.float32),
        in_specs=[smem] + [vmem] * 6,
        out_specs=vmem,
        scratch_shapes=[
            pltpu.VMEM((T, 3 * HP), jnp.float32),   # gathered x-projections
            pltpu.VMEM((T, HP), jnp.float32),       # all hidden states
        ],
    )(tokens.astype(jnp.int32), w_ihT_p, b_x, w_hhT_p, b_hn, w_outT_p, b_out_p)
    return out_padded[:, :C]


def init_params(key, embedding_dim, hidden_dim, tagset_size):
    """Deterministic init mimicking PyTorch U(-1/sqrt(H), 1/sqrt(H))."""
    k = 1.0 / jnp.sqrt(hidden_dim)
    ks = jax.random.split(key, 6)
    u = lambda kk, shape: jax.random.uniform(kk, shape, jnp.float32, -k, k)
    return {
        "w_ih": u(ks[0], (3 * hidden_dim, embedding_dim)),
        "w_hh": u(ks[1], (3 * hidden_dim, hidden_dim)),
        "b_ih": u(ks[2], (3 * hidden_dim,)),
        "b_hh": u(ks[3], (3 * hidden_dim,)),
        "w_out": u(ks[4], (tagset_size, hidden_dim)),
        "b_out": u(ks[5], (tagset_size,)),
    }


def reference_forward(tokens, params, vocab_size):
    """Pure-JAX reference of the PyTorch forward, for correctness checking."""
    H = params["w_hh"].shape[1]
    embeds = jax.nn.one_hot(tokens, vocab_size, dtype=jnp.float32)
    xproj = embeds @ params["w_ih"].T + params["b_ih"]

    def step(h, xp):
        hp = h @ params["w_hh"].T + params["b_hh"]
        r = jax.nn.sigmoid(xp[0:H] + hp[0:H])
        z = jax.nn.sigmoid(xp[H:2 * H] + hp[H:2 * H])
        n = jnp.tanh(xp[2 * H:3 * H] + r * hp[2 * H:3 * H])
        h_new = (1.0 - z) * n + z * h
        return h_new, h_new

    _, hs = lax.scan(step, jnp.zeros((H,), jnp.float32), xproj)
    tag_space = hs @ params["w_out"].T + params["b_out"]
    return jax.nn.log_softmax(tag_space, axis=-1)


if __name__ == "__main__":
    # Spec: vocab_size = 2000; one-hot embedding feeds the GRU (embedding_dim == vocab).
    VOCAB = 2000
    EMBED = VOCAB
    HIDDEN = 32
    TAGS = 8
    SEQ_LEN = 8

    key = jax.random.PRNGKey(0)
    pkey, tkey = jax.random.split(key)
    params = init_params(pkey, EMBED, HIDDEN, TAGS)
    tokens = jax.random.randint(tkey, (SEQ_LEN,), 0, VOCAB, dtype=jnp.int32)

    out = gru_tagger_forward(tokens, params, VOCAB)
    out = jax.block_until_ready(out)

    ref = reference_forward(tokens, params, VOCAB)
    assert out.shape == (SEQ_LEN, TAGS)
    assert jnp.allclose(out, ref, atol=2e-5, rtol=2e-5), "mismatch vs reference"

    print("KERNEL_OK")
</pallas_src>

<mosaic_0001>
module attributes {stable_mosaic.version = 11 : i64} {
  func.func @gru_tagger_kernel(%arg0: memref<8xi32, #tpu.memory_space<smem>>, %arg1: memref<2000x384xf32, #tpu.memory_space<vmem>>, %arg2: memref<1x384xf32, #tpu.memory_space<vmem>>, %arg3: memref<128x384xf32, #tpu.memory_space<vmem>>, %arg4: memref<1x128xf32, #tpu.memory_space<vmem>>, %arg5: memref<128x128xf32, #tpu.memory_space<vmem>>, %arg6: memref<1x128xf32, #tpu.memory_space<vmem>>, %arg7: memref<8x128xf32, #tpu.memory_space<vmem>>, %arg8: memref<8x384xf32, #tpu.memory_space<vmem>>, %arg9: memref<8x128xf32, #tpu.memory_space<vmem>>) attributes {dimension_semantics = [], scalar_prefetch = 0 : i64, scratch_operands = 2 : i64, tpu.core_type = #tpu.core_type<tc>} {
    %c0 = arith.constant 0 : index
    %c0_0 = arith.constant 0 : index
    %0 = vector.load %arg2[%c0, %c0_0] : memref<1x384xf32, #tpu.memory_space<vmem>>, vector<1x384xf32>
    %c0_i32 = arith.constant 0 : i32
    %1 = arith.index_cast %c0_i32 : i32 to index
    %2 = memref.load %arg0[%1] : memref<8xi32, #tpu.memory_space<smem>>
    %3 = arith.index_cast %2 : i32 to index
    %c0_1 = arith.constant 0 : index
    %4 = vector.load %arg1[%3, %c0_1] : memref<2000x384xf32, #tpu.memory_space<vmem>>, vector<1x384xf32>
    %5 = arith.addf %4, %0 : vector<1x384xf32>
    %6 = arith.index_cast %c0_i32 : i32 to index
    %c0_2 = arith.constant 0 : index
    %7 = vector.load %arg8[%6, %c0_2] : memref<8x384xf32, #tpu.memory_space<vmem>>, vector<1x384xf32>
    tpu.vector_store %arg8[%6, %c0_2], %5 {strides = array<i32>} : memref<8x384xf32, #tpu.memory_space<vmem>>, vector<1x384xf32>,
    %c1_i32 = arith.constant 1 : i32
    %8 = arith.index_cast %c1_i32 : i32 to index
    %9 = memref.load %arg0[%8] : memref<8xi32, #tpu.memory_space<smem>>
    %10 = arith.index_cast %9 : i32 to index
    %c0_3 = arith.constant 0 : index
    %11 = vector.load %arg1[%10, %c0_3] : memref<2000x384xf32, #tpu.memory_space<vmem>>, vector<1x384xf32>
    %12 = arith.addf %11, %0 : vector<1x384xf32>
    %13 = arith.index_cast %c1_i32 : i32 to index
    %c0_4 = arith.constant 0 : index
    %14 = vector.load %arg8[%13, %c0_4] : memref<8x384xf32, #tpu.memory_space<vmem>>, vector<1x384xf32>
    tpu.vector_store %arg8[%13, %c0_4], %12 {strides = array<i32>} : memref<8x384xf32, #tpu.memory_space<vmem>>, vector<1x384xf32>,
    %c2_i32 = arith.constant 2 : i32
    %15 = arith.index_cast %c2_i32 : i32 to index
    %16 = memref.load %arg0[%15] : memref<8xi32, #tpu.memory_space<smem>>
    %17 = arith.index_cast %16 : i32 to index
    %c0_5 = arith.constant 0 : index
    %18 = vector.load %arg1[%17, %c0_5] : memref<2000x384xf32, #tpu.memory_space<vmem>>, vector<1x384xf32>
    %19 = arith.addf %18, %0 : vector<1x384xf32>
    %20 = arith.index_cast %c2_i32 : i32 to index
    %c0_6 = arith.constant 0 : index
    %21 = vector.load %arg8[%20, %c0_6] : memref<8x384xf32, #tpu.memory_space<vmem>>, vector<1x384xf32>
    tpu.vector_store %arg8[%20, %c0_6], %19 {strides = array<i32>} : memref<8x384xf32, #tpu.memory_space<vmem>>, vector<1x384xf32>,
    %c3_i32 = arith.constant 3 : i32
    %22 = arith.index_cast %c3_i32 : i32 to index
    %23 = memref.load %arg0[%22] : memref<8xi32, #tpu.memory_space<smem>>
    %24 = arith.index_cast %23 : i32 to index
    %c0_7 = arith.constant 0 : index
    %25 = vector.load %arg1[%24, %c0_7] : memref<2000x384xf32, #tpu.memory_space<vmem>>, vector<1x384xf32>
    %26 = arith.addf %25, %0 : vector<1x384xf32>
    %27 = arith.index_cast %c3_i32 : i32 to index
    %c0_8 = arith.constant 0 : index
    %28 = vector.load %arg8[%27, %c0_8] : memref<8x384xf32, #tpu.memory_space<vmem>>, vector<1x384xf32>
    tpu.vector_store %arg8[%27, %c0_8], %26 {strides = array<i32>} : memref<8x384xf32, #tpu.memory_space<vmem>>, vector<1x384xf32>,
    %c4_i32 = arith.constant 4 : i32
    %29 = arith.index_cast %c4_i32 : i32 to index
    %30 = memref.load %arg0[%29] : memref<8xi32, #tpu.memory_space<smem>>
    %31 = arith.index_cast %30 : i32 to index
    %c0_9 = arith.constant 0 : index
    %32 = vector.load %arg1[%31, %c0_9] : memref<2000x384xf32, #tpu.memory_space<vmem>>, vector<1x384xf32>
    %33 = arith.addf %32, %0 : vector<1x384xf32>
    %34 = arith.index_cast %c4_i32 : i32 to index
    %c0_10 = arith.constant 0 : index
    %35 = vector.load %arg8[%34, %c0_10] : memref<8x384xf32, #tpu.memory_space<vmem>>, vector<1x384xf32>
    tpu.vector_store %arg8[%34, %c0_10], %33 {strides = array<i32>} : memref<8x384xf32, #tpu.memory_space<vmem>>, vector<1x384xf32>,
    %c5_i32 = arith.constant 5 : i32
    %36 = arith.index_cast %c5_i32 : i32 to index
    %37 = memref.load %arg0[%36] : memref<8xi32, #tpu.memory_space<smem>>
    %38 = arith.index_cast %37 : i32 to index
    %c0_11 = arith.constant 0 : index
    %39 = vector.load %arg1[%38, %c0_11] : memref<2000x384xf32, #tpu.memory_space<vmem>>, vector<1x384xf32>
    %40 = arith.addf %39, %0 : vector<1x384xf32>
    %41 = arith.index_cast %c5_i32 : i32 to index
    %c0_12 = arith.constant 0 : index
    %42 = vector.load %arg8[%41, %c0_12] : memref<8x384xf32, #tpu.memory_space<vmem>>, vector<1x384xf32>
    tpu.vector_store %arg8[%41, %c0_12], %40 {strides = array<i32>} : memref<8x384xf32, #tpu.memory_space<vmem>>, vector<1x384xf32>,
    %c6_i32 = arith.constant 6 : i32
    %43 = arith.index_cast %c6_i32 : i32 to index
    %44 = memref.load %arg0[%43] : memref<8xi32, #tpu.memory_space<smem>>
    %45 = arith.index_cast %44 : i32 to index
    %c0_13 = arith.constant 0 : index
    %46 = vector.load %arg1[%45, %c0_13] : memref<2000x384xf32, #tpu.memory_space<vmem>>, vector<1x384xf32>
    %47 = arith.addf %46, %0 : vector<1x384xf32>
    %48 = arith.index_cast %c6_i32 : i32 to index
    %c0_14 = arith.constant 0 : index
    %49 = vector.load %arg8[%48, %c0_14] : memref<8x384xf32, #tpu.memory_space<vmem>>, vector<1x384xf32>
    tpu.vector_store %arg8[%48, %c0_14], %47 {strides = array<i32>} : memref<8x384xf32, #tpu.memory_space<vmem>>, vector<1x384xf32>,
    %c7_i32 = arith.constant 7 : i32
    %50 = arith.index_cast %c7_i32 : i32 to index
    %51 = memref.load %arg0[%50] : memref<8xi32, #tpu.memory_space<smem>>
    %52 = arith.index_cast %51 : i32 to index
    %c0_15 = arith.constant 0 : index
    %53 = vector.load %arg1[%52, %c0_15] : memref<2000x384xf32, #tpu.memory_space<vmem>>, vector<1x384xf32>
    %54 = arith.addf %53, %0 : vector<1x384xf32>
    %55 = arith.index_cast %c7_i32 : i32 to index
    %c0_16 = arith.constant 0 : index
    %56 = vector.load %arg8[%55, %c0_16] : memref<8x384xf32, #tpu.memory_space<vmem>>, vector<1x384xf32>
    tpu.vector_store %arg8[%55, %c0_16], %54 {strides = array<i32>} : memref<8x384xf32, #tpu.memory_space<vmem>>, vector<1x384xf32>,
    %c8_i32 = arith.constant 8 : i32
    %c0_17 = arith.constant 0 : index
    %c0_18 = arith.constant 0 : index
    %57 = vector.load %arg3[%c0_17, %c0_18] : memref<128x384xf32, #tpu.memory_space<vmem>>, vector<128x384xf32>
    %c0_19 = arith.constant 0 : index
    %c0_20 = arith.constant 0 : index
    %58 = vector.load %arg4[%c0_19, %c0_20] : memref<1x128xf32, #tpu.memory_space<vmem>>, vector<1x128xf32>
    %cst = arith.constant 0.000000e+00 : f32
    %59 = vector.broadcast %cst : f32 to vector<1x128xf32>
    %c0_i32_21 = arith.constant 0 : i32
    %cst_22 = arith.constant dense<0.000000e+00> : vector<1x384xf32>
    %60 = tpu.matmul %59, %57, %cst_22 {dimension_numbers = #tpu.dot_dimension_numbers<[1], [0], [0], [1], [0, 0, 1, 1], [], []>} : vector<1x128xf32>, vector<128x384xf32>, vector<1x384xf32> -> vector<1x384xf32>
    %61 = arith.index_cast %c0_i32_21 : i32 to index
    %c0_23 = arith.constant 0 : index
    %62 = vector.load %arg8[%61, %c0_23] : memref<8x384xf32, #tpu.memory_space<vmem>>, vector<1x384xf32>
    %63 = vector.extract_strided_slice %62 {offsets = [0, 0], sizes = [1, 128], strides = [1, 1]} : vector<1x384xf32> to vector<1x128xf32>
    %64 = vector.extract_strided_slice %60 {offsets = [0, 0], sizes = [1, 128], strides = [1, 1]} : vector<1x384xf32> to vector<1x128xf32>
    %65 = arith.addf %63, %64 : vector<1x128xf32>
    %66 = arith.negf %65 : vector<1x128xf32>
    %67 = math.exp %66 : vector<1x128xf32>
    %cst_24 = arith.constant 1.000000e+00 : f32
    %68 = vector.broadcast %cst_24 : f32 to vector<1x128xf32>
    %69 = arith.addf %68, %67 : vector<1x128xf32>
    %70 = arith.divf %68, %69 : vector<1x128xf32>
    %71 = vector.extract_strided_slice %62 {offsets = [0, 128], sizes = [1, 128], strides = [1, 1]} : vector<1x384xf32> to vector<1x128xf32>
    %72 = vector.extract_strided_slice %60 {offsets = [0, 128], sizes = [1, 128], strides = [1, 1]} : vector<1x384xf32> to vector<1x128xf32>
    %73 = arith.addf %71, %72 : vector<1x128xf32>
    %74 = arith.negf %73 : vector<1x128xf32>
    %75 = math.exp %74 : vector<1x128xf32>
    %cst_25 = arith.constant 1.000000e+00 : f32
    %76 = vector.broadcast %cst_25 : f32 to vector<1x128xf32>
    %77 = arith.addf %76, %75 : vector<1x128xf32>
    %78 = arith.divf %76, %77 : vector<1x128xf32>
    %79 = vector.extract_strided_slice %62 {offsets = [0, 256], sizes = [1, 128], strides = [1, 1]} : vector<1x384xf32> to vector<1x128xf32>
    %80 = vector.extract_strided_slice %60 {offsets = [0, 256], sizes = [1, 128], strides = [1, 1]} : vector<1x384xf32> to vector<1x128xf32>
    %81 = arith.addf %80, %58 : vector<1x128xf32>
    %82 = arith.mulf %70, %81 : vector<1x128xf32>
    %83 = arith.addf %79, %82 : vector<1x128xf32>
    %84 = math.tanh %83 : vector<1x128xf32>
    %85 = arith.subf %59, %84 : vector<1x128xf32>
    %86 = arith.mulf %78, %85 : vector<1x128xf32>
    %87 = arith.addf %84, %86 : vector<1x128xf32>
    %88 = arith.index_cast %c0_i32_21 : i32 to index
    %c0_26 = arith.constant 0 : index
    %89 = vector.load %arg9[%88, %c0_26] : memref<8x128xf32, #tpu.memory_space<vmem>>, vector<1x128xf32>
    tpu.vector_store %arg9[%88, %c0_26], %87 {strides = array<i32>} : memref<8x128xf32, #tpu.memory_space<vmem>>, vector<1x128xf32>,
    %c1_i32_27 = arith.constant 1 : i32
    %cst_28 = arith.constant dense<0.000000e+00> : vector<1x384xf32>
    %90 = tpu.matmul %87, %57, %cst_28 {dimension_numbers = #tpu.dot_dimension_numbers<[1], [0], [0], [1], [0, 0, 1, 1], [], []>} : vector<1x128xf32>, vector<128x384xf32>, vector<1x384xf32> -> vector<1x384xf32>
    %91 = arith.index_cast %c1_i32_27 : i32 to index
    %c0_29 = arith.constant 0 : index
    %92 = vector.load %arg8[%91, %c0_29] : memref<8x384xf32, #tpu.memory_space<vmem>>, vector<1x384xf32>
    %93 = vector.extract_strided_slice %92 {offsets = [0, 0], sizes = [1, 128], strides = [1, 1]} : vector<1x384xf32> to vector<1x128xf32>
    %94 = vector.extract_strided_slice %90 {offsets = [0, 0], sizes = [1, 128], strides = [1, 1]} : vector<1x384xf32> to vector<1x128xf32>
    %95 = arith.addf %93, %94 : vector<1x128xf32>
    %96 = arith.negf %95 : vector<1x128xf32>
    %97 = math.exp %96 : vector<1x128xf32>
    %cst_30 = arith.constant 1.000000e+00 : f32
    %98 = vector.broadcast %cst_30 : f32 to vector<1x128xf32>
    %99 = arith.addf %98, %97 : vector<1x128xf32>
    %100 = arith.divf %98, %99 : vector<1x128xf32>
    %101 = vector.extract_strided_slice %92 {offsets = [0, 128], sizes = [1, 128], strides = [1, 1]} : vector<1x384xf32> to vector<1x128xf32>
    %102 = vector.extract_strided_slice %90 {offsets = [0, 128], sizes = [1, 128], strides = [1, 1]} : vector<1x384xf32> to vector<1x128xf32>
    %103 = arith.addf %101, %102 : vector<1x128xf32>
    %104 = arith.negf %103 : vector<1x128xf32>
    %105 = math.exp %104 : vector<1x128xf32>
    %cst_31 = arith.constant 1.000000e+00 : f32
    %106 = vector.broadcast %cst_31 : f32 to vector<1x128xf32>
    %107 = arith.addf %106, %105 : vector<1x128xf32>
    %108 = arith.divf %106, %107 : vector<1x128xf32>
    %109 = vector.extract_strided_slice %92 {offsets = [0, 256], sizes = [1, 128], strides = [1, 1]} : vector<1x384xf32> to vector<1x128xf32>
    %110 = vector.extract_strided_slice %90 {offsets = [0, 256], sizes = [1, 128], strides = [1, 1]} : vector<1x384xf32> to vector<1x128xf32>
    %111 = arith.addf %110, %58 : vector<1x128xf32>
    %112 = arith.mulf %100, %111 : vector<1x128xf32>
    %113 = arith.addf %109, %112 : vector<1x128xf32>
    %114 = math.tanh %113 : vector<1x128xf32>
    %115 = arith.subf %87, %114 : vector<1x128xf32>
    %116 = arith.mulf %108, %115 : vector<1x128xf32>
    %117 = arith.addf %114, %116 : vector<1x128xf32>
    %118 = arith.index_cast %c1_i32_27 : i32 to index
    %c0_32 = arith.constant 0 : index
    %119 = vector.load %arg9[%118, %c0_32] : memref<8x128xf32, #tpu.memory_space<vmem>>, vector<1x128xf32>
    tpu.vector_store %arg9[%118, %c0_32], %117 {strides = array<i32>} : memref<8x128xf32, #tpu.memory_space<vmem>>, vector<1x128xf32>,
    %c2_i32_33 = arith.constant 2 : i32
    %cst_34 = arith.constant dense<0.000000e+00> : vector<1x384xf32>
    %120 = tpu.matmul %117, %57, %cst_34 {dimension_numbers = #tpu.dot_dimension_numbers<[1], [0], [0], [1], [0, 0, 1, 1], [], []>} : vector<1x128xf32>, vector<128x384xf32>, vector<1x384xf32> -> vector<1x384xf32>
    %121 = arith.index_cast %c2_i32_33 : i32 to index
    %c0_35 = arith.constant 0 : index
    %122 = vector.load %arg8[%121, %c0_35] : memref<8x384xf32, #tpu.memory_space<vmem>>, vector<1x384xf32>
    %123 = vector.extract_strided_slice %122 {offsets = [0, 0], sizes = [1, 128], strides = [1, 1]} : vector<1x384xf32> to vector<1x128xf32>
    %124 = vector.extract_strided_slice %120 {offsets = [0, 0], sizes = [1, 128], strides = [1, 1]} : vector<1x384xf32> to vector<1x128xf32>
    %125 = arith.addf %123, %124 : vector<1x128xf32>
    %126 = arith.negf %125 : vector<1x128xf32>
    %127 = math.exp %126 : vector<1x128xf32>
    %cst_36 = arith.constant 1.000000e+00 : f32
    %128 = vector.broadcast %cst_36 : f32 to vector<1x128xf32>
    %129 = arith.addf %128, %127 : vector<1x128xf32>
    %130 = arith.divf %128, %129 : vector<1x128xf32>
    %131 = vector.extract_strided_slice %122 {offsets = [0, 128], sizes = [1, 128], strides = [1, 1]} : vector<1x384xf32> to vector<1x128xf32>
    %132 = vector.extract_strided_slice %120 {offsets = [0, 128], sizes = [1, 128], strides = [1, 1]} : vector<1x384xf32> to vector<1x128xf32>
    %133 = arith.addf %131, %132 : vector<1x128xf32>
    %134 = arith.negf %133 : vector<1x128xf32>
    %135 = math.exp %134 : vector<1x128xf32>
    %cst_37 = arith.constant 1.000000e+00 : f32
    %136 = vector.broadcast %cst_37 : f32 to vector<1x128xf32>
    %137 = arith.addf %136, %135 : vector<1x128xf32>
    %138 = arith.divf %136, %137 : vector<1x128xf32>
    %139 = vector.extract_strided_slice %122 {offsets = [0, 256], sizes = [1, 128], strides = [1, 1]} : vector<1x384xf32> to vector<1x128xf32>
    %140 = vector.extract_strided_slice %120 {offsets = [0, 256], sizes = [1, 128], strides = [1, 1]} : vector<1x384xf32> to vector<1x128xf32>
    %141 = arith.addf %140, %58 : vector<1x128xf32>
    %142 = arith.mulf %130, %141 : vector<1x128xf32>
    %143 = arith.addf %139, %142 : vector<1x128xf32>
    %144 = math.tanh %143 : vector<1x128xf32>
    %145 = arith.subf %117, %144 : vector<1x128xf32>
    %146 = arith.mulf %138, %145 : vector<1x128xf32>
    %147 = arith.addf %144, %146 : vector<1x128xf32>
    %148 = arith.index_cast %c2_i32_33 : i32 to index
    %c0_38 = arith.constant 0 : index
    %149 = vector.load %arg9[%148, %c0_38] : memref<8x128xf32, #tpu.memory_space<vmem>>, vector<1x128xf32>
    tpu.vector_store %arg9[%148, %c0_38], %147 {strides = array<i32>} : memref<8x128xf32, #tpu.memory_space<vmem>>, vector<1x128xf32>,
    %c3_i32_39 = arith.constant 3 : i32
    %cst_40 = arith.constant dense<0.000000e+00> : vector<1x384xf32>
    %150 = tpu.matmul %147, %57, %cst_40 {dimension_numbers = #tpu.dot_dimension_numbers<[1], [0], [0], [1], [0, 0, 1, 1], [], []>} : vector<1x128xf32>, vector<128x384xf32>, vector<1x384xf32> -> vector<1x384xf32>
    %151 = arith.index_cast %c3_i32_39 : i32 to index
    %c0_41 = arith.constant 0 : index
    %152 = vector.load %arg8[%151, %c0_41] : memref<8x384xf32, #tpu.memory_space<vmem>>, vector<1x384xf32>
    %153 = vector.extract_strided_slice %152 {offsets = [0, 0], sizes = [1, 128], strides = [1, 1]} : vector<1x384xf32> to vector<1x128xf32>
    %154 = vector.extract_strided_slice %150 {offsets = [0, 0], sizes = [1, 128], strides = [1, 1]} : vector<1x384xf32> to vector<1x128xf32>
    %155 = arith.addf %153, %154 : vector<1x128xf32>
    %156 = arith.negf %155 : vector<1x128xf32>
    %157 = math.exp %156 : vector<1x128xf32>
    %cst_42 = arith.constant 1.000000e+00 : f32
    %158 = vector.broadcast %cst_42 : f32 to vector<1x128xf32>
    %159 = arith.addf %158, %157 : vector<1x128xf32>
    %160 = arith.divf %158, %159 : vector<1x128xf32>
    %161 = vector.extract_strided_slice %152 {offsets = [0, 128], sizes = [1, 128], strides = [1, 1]} : vector<1x384xf32> to vector<1x128xf32>
    %162 = vector.extract_strided_slice %150 {offsets = [0, 128], sizes = [1, 128], strides = [1, 1]} : vector<1x384xf32> to vector<1x128xf32>
    %163 = arith.addf %161, %162 : vector<1x128xf32>
    %164 = arith.negf %163 : vector<1x128xf32>
    %165 = math.exp %164 : vector<1x128xf32>
    %cst_43 = arith.constant 1.000000e+00 : f32
    %166 = vector.broadcast %cst_43 : f32 to vector<1x128xf32>
    %167 = arith.addf %166, %165 : vector<1x128xf32>
    %168 = arith.divf %166, %167 : vector<1x128xf32>
    %169 = vector.extract_strided_slice %152 {offsets = [0, 256], sizes = [1, 128], strides = [1, 1]} : vector<1x384xf32> to vector<1x128xf32>
    %170 = vector.extract_strided_slice %150 {offsets = [0, 256], sizes = [1, 128], strides = [1, 1]} : vector<1x384xf32> to vector<1x128xf32>
    %171 = arith.addf %170, %58 : vector<1x128xf32>
    %172 = arith.mulf %160, %171 : vector<1x128xf32>
    %173 = arith.addf %169, %172 : vector<1x128xf32>
    %174 = math.tanh %173 : vector<1x128xf32>
    %175 = arith.subf %147, %174 : vector<1x128xf32>
    %176 = arith.mulf %168, %175 : vector<1x128xf32>
    %177 = arith.addf %174, %176 : vector<1x128xf32>
    %178 = arith.index_cast %c3_i32_39 : i32 to index
    %c0_44 = arith.constant 0 : index
    %179 = vector.load %arg9[%178, %c0_44] : memref<8x128xf32, #tpu.memory_space<vmem>>, vector<1x128xf32>
    tpu.vector_store %arg9[%178, %c0_44], %177 {strides = array<i32>} : memref<8x128xf32, #tpu.memory_space<vmem>>, vector<1x128xf32>,
    %c4_i32_45 = arith.constant 4 : i32
    %cst_46 = arith.constant dense<0.000000e+00> : vector<1x384xf32>
    %180 = tpu.matmul %177, %57, %cst_46 {dimension_numbers = #tpu.dot_dimension_numbers<[1], [0], [0], [1], [0, 0, 1, 1], [], []>} : vector<1x128xf32>, vector<128x384xf32>, vector<1x384xf32> -> vector<1x384xf32>
    %181 = arith.index_cast %c4_i32_45 : i32 to index
    %c0_47 = arith.constant 0 : index
    %182 = vector.load %arg8[%181, %c0_47] : memref<8x384xf32, #tpu.memory_space<vmem>>, vector<1x384xf32>
    %183 = vector.extract_strided_slice %182 {offsets = [0, 0], sizes = [1, 128], strides = [1, 1]} : vector<1x384xf32> to vector<1x128xf32>
    %184 = vector.extract_strided_slice %180 {offsets = [0, 0], sizes = [1, 128], strides = [1, 1]} : vector<1x384xf32> to vector<1x128xf32>
    %185 = arith.addf %183, %184 : vector<1x128xf32>
    %186 = arith.negf %185 : vector<1x128xf32>
    %187 = math.exp %186 : vector<1x128xf32>
    %cst_48 = arith.constant 1.000000e+00 : f32
    %188 = vector.broadcast %cst_48 : f32 to vector<1x128xf32>
    %189 = arith.addf %188, %187 : vector<1x128xf32>
    %190 = arith.divf %188, %189 : vector<1x128xf32>
    %191 = vector.extract_strided_slice %182 {offsets = [0, 128], sizes = [1, 128], strides = [1, 1]} : vector<1x384xf32> to vector<1x128xf32>
    %192 = vector.extract_strided_slice %180 {offsets = [0, 128], sizes = [1, 128], strides = [1, 1]} : vector<1x384xf32> to vector<1x128xf32>
    %193 = arith.addf %191, %192 : vector<1x128xf32>
    %194 = arith.negf %193 : vector<1x128xf32>
    %195 = math.exp %194 : vector<1x128xf32>
    %cst_49 = arith.constant 1.000000e+00 : f32
    %196 = vector.broadcast %cst_49 : f32 to vector<1x128xf32>
    %197 = arith.addf %196, %195 : vector<1x128xf32>
    %198 = arith.divf %196, %197 : vector<1x128xf32>
    %199 = vector.extract_strided_slice %182 {offsets = [0, 256], sizes = [1, 128], strides = [1, 1]} : vector<1x384xf32> to vector<1x128xf32>
    %200 = vector.extract_strided_slice %180 {offsets = [0, 256], sizes = [1, 128], strides = [1, 1]} : vector<1x384xf32> to vector<1x128xf32>
    %201 = arith.addf %200, %58 : vector<1x128xf32>
    %202 = arith.mulf %190, %201 : vector<1x128xf32>
    %203 = arith.addf %199, %202 : vector<1x128xf32>
    %204 = math.tanh %203 : vector<1x128xf32>
    %205 = arith.subf %177, %204 : vector<1x128xf32>
    %206 = arith.mulf %198, %205 : vector<1x128xf32>
    %207 = arith.addf %204, %206 : vector<1x128xf32>
    %208 = arith.index_cast %c4_i32_45 : i32 to index
    %c0_50 = arith.constant 0 : index
    %209 = vector.load %arg9[%208, %c0_50] : memref<8x128xf32, #tpu.memory_space<vmem>>, vector<1x128xf32>
    tpu.vector_store %arg9[%208, %c0_50], %207 {strides = array<i32>} : memref<8x128xf32, #tpu.memory_space<vmem>>, vector<1x128xf32>,
    %c5_i32_51 = arith.constant 5 : i32
    %cst_52 = arith.constant dense<0.000000e+00> : vector<1x384xf32>
    %210 = tpu.matmul %207, %57, %cst_52 {dimension_numbers = #tpu.dot_dimension_numbers<[1], [0], [0], [1], [0, 0, 1, 1], [], []>} : vector<1x128xf32>, vector<128x384xf32>, vector<1x384xf32> -> vector<1x384xf32>
    %211 = arith.index_cast %c5_i32_51 : i32 to index
    %c0_53 = arith.constant 0 : index
    %212 = vector.load %arg8[%211, %c0_53] : memref<8x384xf32, #tpu.memory_space<vmem>>, vector<1x384xf32>
    %213 = vector.extract_strided_slice %212 {offsets = [0, 0], sizes = [1, 128], strides = [1, 1]} : vector<1x384xf32> to vector<1x128xf32>
    %214 = vector.extract_strided_slice %210 {offsets = [0, 0], sizes = [1, 128], strides = [1, 1]} : vector<1x384xf32> to vector<1x128xf32>
    %215 = arith.addf %213, %214 : vector<1x128xf32>
    %216 = arith.negf %215 : vector<1x128xf32>
    %217 = math.exp %216 : vector<1x128xf32>
    %cst_54 = arith.constant 1.000000e+00 : f32
    %218 = vector.broadcast %cst_54 : f32 to vector<1x128xf32>
    %219 = arith.addf %218, %217 : vector<1x128xf32>
    %220 = arith.divf %218, %219 : vector<1x128xf32>
    %221 = vector.extract_strided_slice %212 {offsets = [0, 128], sizes = [1, 128], strides = [1, 1]} : vector<1x384xf32> to vector<1x128xf32>
    %222 = vector.extract_strided_slice %210 {offsets = [0, 128], sizes = [1, 128], strides = [1, 1]} : vector<1x384xf32> to vector<1x128xf32>
    %223 = arith.addf %221, %222 : vector<1x128xf32>
    %224 = arith.negf %223 : vector<1x128xf32>
    %225 = math.exp %224 : vector<1x128xf32>
    %cst_55 = arith.constant 1.000000e+00 : f32
    %226 = vector.broadcast %cst_55 : f32 to vector<1x128xf32>
    %227 = arith.addf %226, %225 : vector<1x128xf32>
    %228 = arith.divf %226, %227 : vector<1x128xf32>
    %229 = vector.extract_strided_slice %212 {offsets = [0, 256], sizes = [1, 128], strides = [1, 1]} : vector<1x384xf32> to vector<1x128xf32>
    %230 = vector.extract_strided_slice %210 {offsets = [0, 256], sizes = [1, 128], strides = [1, 1]} : vector<1x384xf32> to vector<1x128xf32>
    %231 = arith.addf %230, %58 : vector<1x128xf32>
    %232 = arith.mulf %220, %231 : vector<1x128xf32>
    %233 = arith.addf %229, %232 : vector<1x128xf32>
    %234 = math.tanh %233 : vector<1x128xf32>
    %235 = arith.subf %207, %234 : vector<1x128xf32>
    %236 = arith.mulf %228, %235 : vector<1x128xf32>
    %237 = arith.addf %234, %236 : vector<1x128xf32>
    %238 = arith.index_cast %c5_i32_51 : i32 to index
    %c0_56 = arith.constant 0 : index
    %239 = vector.load %arg9[%238, %c0_56] : memref<8x128xf32, #tpu.memory_space<vmem>>, vector<1x128xf32>
    tpu.vector_store %arg9[%238, %c0_56], %237 {strides = array<i32>} : memref<8x128xf32, #tpu.memory_space<vmem>>, vector<1x128xf32>,
    %c6_i32_57 = arith.constant 6 : i32
    %cst_58 = arith.constant dense<0.000000e+00> : vector<1x384xf32>
    %240 = tpu.matmul %237, %57, %cst_58 {dimension_numbers = #tpu.dot_dimension_numbers<[1], [0], [0], [1], [0, 0, 1, 1], [], []>} : vector<1x128xf32>, vector<128x384xf32>, vector<1x384xf32> -> vector<1x384xf32>
    %241 = arith.index_cast %c6_i32_57 : i32 to index
    %c0_59 = arith.constant 0 : index
    %242 = vector.load %arg8[%241, %c0_59] : memref<8x384xf32, #tpu.memory_space<vmem>>, vector<1x384xf32>
    %243 = vector.extract_strided_slice %242 {offsets = [0, 0], sizes = [1, 128], strides = [1, 1]} : vector<1x384xf32> to vector<1x128xf32>
    %244 = vector.extract_strided_slice %240 {offsets = [0, 0], sizes = [1, 128], strides = [1, 1]} : vector<1x384xf32> to vector<1x128xf32>
    %245 = arith.addf %243, %244 : vector<1x128xf32>
    %246 = arith.negf %245 : vector<1x128xf32>
    %247 = math.exp %246 : vector<1x128xf32>
    %cst_60 = arith.constant 1.000000e+00 : f32
    %248 = vector.broadcast %cst_60 : f32 to vector<1x128xf32>
    %249 = arith.addf %248, %247 : vector<1x128xf32>
    %250 = arith.divf %248, %249 : vector<1x128xf32>
    %251 = vector.extract_strided_slice %242 {offsets = [0, 128], sizes = [1, 128], strides = [1, 1]} : vector<1x384xf32> to vector<1x128xf32>
    %252 = vector.extract_strided_slice %240 {offsets = [0, 128], sizes = [1, 128], strides = [1, 1]} : vector<1x384xf32> to vector<1x128xf32>
    %253 = arith.addf %251, %252 : vector<1x128xf32>
    %254 = arith.negf %253 : vector<1x128xf32>
    %255 = math.exp %254 : vector<1x128xf32>
    %cst_61 = arith.constant 1.000000e+00 : f32
    %256 = vector.broadcast %cst_61 : f32 to vector<1x128xf32>
    %257 = arith.addf %256, %255 : vector<1x128xf32>
    %258 = arith.divf %256, %257 : vector<1x128xf32>
    %259 = vector.extract_strided_slice %242 {offsets = [0, 256], sizes = [1, 128], strides = [1, 1]} : vector<1x384xf32> to vector<1x128xf32>
    %260 = vector.extract_strided_slice %240 {offsets = [0, 256], sizes = [1, 128], strides = [1, 1]} : vector<1x384xf32> to vector<1x128xf32>
    %261 = arith.addf %260, %58 : vector<1x128xf32>
    %262 = arith.mulf %250, %261 : vector<1x128xf32>
    %263 = arith.addf %259, %262 : vector<1x128xf32>
    %264 = math.tanh %263 : vector<1x128xf32>
    %265 = arith.subf %237, %264 : vector<1x128xf32>
    %266 = arith.mulf %258, %265 : vector<1x128xf32>
    %267 = arith.addf %264, %266 : vector<1x128xf32>
    %268 = arith.index_cast %c6_i32_57 : i32 to index
    %c0_62 = arith.constant 0 : index
    %269 = vector.load %arg9[%268, %c0_62] : memref<8x128xf32, #tpu.memory_space<vmem>>, vector<1x128xf32>
    tpu.vector_store %arg9[%268, %c0_62], %267 {strides = array<i32>} : memref<8x128xf32, #tpu.memory_space<vmem>>, vector<1x128xf32>,
    %c7_i32_63 = arith.constant 7 : i32
    %cst_64 = arith.constant dense<0.000000e+00> : vector<1x384xf32>
    %270 = tpu.matmul %267, %57, %cst_64 {dimension_numbers = #tpu.dot_dimension_numbers<[1], [0], [0], [1], [0, 0, 1, 1], [], []>} : vector<1x128xf32>, vector<128x384xf32>, vector<1x384xf32> -> vector<1x384xf32>
    %271 = arith.index_cast %c7_i32_63 : i32 to index
    %c0_65 = arith.constant 0 : index
    %272 = vector.load %arg8[%271, %c0_65] : memref<8x384xf32, #tpu.memory_space<vmem>>, vector<1x384xf32>
    %273 = vector.extract_strided_slice %272 {offsets = [0, 0], sizes = [1, 128], strides = [1, 1]} : vector<1x384xf32> to vector<1x128xf32>
    %274 = vector.extract_strided_slice %270 {offsets = [0, 0], sizes = [1, 128], strides = [1, 1]} : vector<1x384xf32> to vector<1x128xf32>
    %275 = arith.addf %273, %274 : vector<1x128xf32>
    %276 = arith.negf %275 : vector<1x128xf32>
    %277 = math.exp %276 : vector<1x128xf32>
    %cst_66 = arith.constant 1.000000e+00 : f32
    %278 = vector.broadcast %cst_66 : f32 to vector<1x128xf32>
    %279 = arith.addf %278, %277 : vector<1x128xf32>
    %280 = arith.divf %278, %279 : vector<1x128xf32>
    %281 = vector.extract_strided_slice %272 {offsets = [0, 128], sizes = [1, 128], strides = [1, 1]} : vector<1x384xf32> to vector<1x128xf32>
    %282 = vector.extract_strided_slice %270 {offsets = [0, 128], sizes = [1, 128], strides = [1, 1]} : vector<1x384xf32> to vector<1x128xf32>
    %283 = arith.addf %281, %282 : vector<1x128xf32>
    %284 = arith.negf %283 : vector<1x128xf32>
    %285 = math.exp %284 : vector<1x128xf32>
    %cst_67 = arith.constant 1.000000e+00 : f32
    %286 = vector.broadcast %cst_67 : f32 to vector<1x128xf32>
    %287 = arith.addf %286, %285 : vector<1x128xf32>
    %288 = arith.divf %286, %287 : vector<1x128xf32>
    %289 = vector.extract_strided_slice %272 {offsets = [0, 256], sizes = [1, 128], strides = [1, 1]} : vector<1x384xf32> to vector<1x128xf32>
    %290 = vector.extract_strided_slice %270 {offsets = [0, 256], sizes = [1, 128], strides = [1, 1]} : vector<1x384xf32> to vector<1x128xf32>
    %291 = arith.addf %290, %58 : vector<1x128xf32>
    %292 = arith.mulf %280, %291 : vector<1x128xf32>
    %293 = arith.addf %289, %292 : vector<1x128xf32>
    %294 = math.tanh %293 : vector<1x128xf32>
    %295 = arith.subf %267, %294 : vector<1x128xf32>
    %296 = arith.mulf %288, %295 : vector<1x128xf32>
    %297 = arith.addf %294, %296 : vector<1x128xf32>
    %298 = arith.index_cast %c7_i32_63 : i32 to index
    %c0_68 = arith.constant 0 : index
    %299 = vector.load %arg9[%298, %c0_68] : memref<8x128xf32, #tpu.memory_space<vmem>>, vector<1x128xf32>
    tpu.vector_store %arg9[%298, %c0_68], %297 {strides = array<i32>} : memref<8x128xf32, #tpu.memory_space<vmem>>, vector<1x128xf32>,
    %c8_i32_69 = arith.constant 8 : i32
    %c0_70 = arith.constant 0 : index
    %c0_71 = arith.constant 0 : index
    %300 = vector.load %arg9[%c0_70, %c0_71] : memref<8x128xf32, #tpu.memory_space<vmem>>, vector<8x128xf32>
    %c0_72 = arith.constant 0 : index
    %c0_73 = arith.constant 0 : index
    %301 = vector.load %arg5[%c0_72, %c0_73] : memref<128x128xf32, #tpu.memory_space<vmem>>, vector<128x128xf32>
    %cst_74 = arith.constant dense<0.000000e+00> : vector<8x128xf32>
    %302 = tpu.matmul %300, %301, %cst_74 {dimension_numbers = #tpu.dot_dimension_numbers<[1], [0], [0], [1], [0, 0, 1, 1], [], []>} : vector<8x128xf32>, vector<128x128xf32>, vector<8x128xf32> -> vector<8x128xf32>
    %c0_75 = arith.constant 0 : index
    %c0_76 = arith.constant 0 : index
    %303 = vector.load %arg6[%c0_75, %c0_76] : memref<1x128xf32, #tpu.memory_space<vmem>>, vector<1x128xf32>
    %304 = vector.broadcast %303 : vector<1x128xf32> to vector<8x128xf32>
    %305 = arith.addf %302, %304 : vector<8x128xf32>
    %306 = tpu.iota {dimensions = array<i32: 1>} : vector<8x128xi32>
    %c8_i32_77 = arith.constant 8 : i32
    %307 = vector.broadcast %c8_i32_77 : i32 to vector<8x128xi32>
    %308 = arith.cmpi slt, %306, %307 : vector<8x128xi32>
    %cst_78 = arith.constant -1.000000e+30 : f32
    %309 = vector.broadcast %cst_78 : f32 to vector<8x128xf32>
    %310 = arith.select %308, %305, %309 : vector<8x128xi1>, vector<8x128xf32>
    %cst_79 = arith.constant dense<0xFF800000> : vector<8xf32>
    %311 = vector.multi_reduction <maximumf>, %310, %cst_79 [1] : vector<8x128xf32> to vector<8xf32>
    %312 = vector.shape_cast %311 : vector<8xf32> to vector<8x1xf32>
    %313 = vector.broadcast %312 : vector<8x1xf32> to vector<8x128xf32>
    %314 = arith.subf %305, %313 : vector<8x128xf32>
    %315 = math.exp %314 : vector<8x128xf32>
    %cst_80 = arith.constant 0.000000e+00 : f32
    %316 = vector.broadcast %cst_80 : f32 to vector<8x128xf32>
    %317 = arith.select %308, %315, %316 : vector<8x128xi1>, vector<8x128xf32>
    %cst_81 = arith.constant dense<0.000000e+00> : vector<8xf32>
    %318 = vector.multi_reduction <add>, %317, %cst_81 [1] : vector<8x128xf32> to vector<8xf32>
    %319 = vector.shape_cast %318 : vector<8xf32> to vector<8x1xf32>
    %320 = math.log %319 : vector<8x1xf32>
    %321 = arith.addf %312, %320 : vector<8x1xf32>
    %322 = vector.broadcast %321 : vector<8x1xf32> to vector<8x128xf32>
    %323 = arith.subf %305, %322 : vector<8x128xf32>
    %c0_82 = arith.constant 0 : index
    %c0_83 = arith.constant 0 : index
    %324 = vector.load %arg7[%c0_82, %c0_83] : memref<8x128xf32, #tpu.memory_space<vmem>>, vector<8x128xf32>
    tpu.vector_store %arg7[%c0_82, %c0_83], %323 {strides = array<i32>} : memref<8x128xf32, #tpu.memory_space<vmem>>, vector<8x128xf32>,
    return
  }
}

</mosaic_0001>

<bundles_post_ra>
// kernel: tpu_custom_call.1
= control target key start
LH: loop header
LB: loop body
LE: loop exit
PB: predicated region body
PF: predicated region fallthrough
CT: control target
= control target key end

     0   :  { %12 = vsyncpa [#allocation7], 0  ;;  %s2400_s0 = inlined_call_operand.hbm [shape: s32[8], index: 0, kind: input, shape index: {}]   ;;  %s2401_s1 = inlined_call_operand.hbm [shape: f32[2000,384], index: 1, kind: input, shape index: {}]   ;;  %s2402_s2 = inlined_call_operand.hbm [shape: f32[1,384], index: 2, kind: input, shape index: {}]   ;;  %s2403_s3 = inlined_call_operand.hbm [shape: f32[128,384], index: 3, kind: input, shape index: {}]   ;;  %s2404_s4 = inlined_call_operand.hbm [shape: f32[1,128], index: 4, kind: input, shape index: {}]   ;;  %s2405_s5 = inlined_call_operand.hbm [shape: f32[128,128], index: 5, kind: input, shape index: {}]   ;;  %s2406_s6 = inlined_call_operand.hbm [shape: f32[1,128], index: 6, kind: input, shape index: {}]   ;;  %s2407_s7 = inlined_call_operand.hbm [shape: f32[8,128], index: 7, kind: output, shape index: {}]  }
   0x1   :  { %13 = vsyncpa [#allocation5], 0 }
   0x2   :  { %14 = vsyncpa [#allocation10], 0 }
   0x3   :  { %15 = vsyncpa [#allocation13], 0 }
   0x4   :  { %16 = vsyncpa [#allocation16], 0  ;;  %s45_s26 = sshll.u32 %s2402_s2, 4  ;;  %s46_s26 = int_to_ptr.hbm [resolvable:$true] %s45_s26 }
   0x5   :  { %17 = vsyncpa [#allocation6], 0  ;;  %s1679_s27 = smov [#allocation9]   ;;  %s69_s8 = sshll.u32 %s2404_s4, 4  ;;  %s70_s8 = int_to_ptr.hbm [resolvable:$true] %s69_s8 }
   0x6   :  { %s47_s28 = sshll.u32 %s1679_s27, 4  ;;  %s1680_s9 = smov [#allocation12]   ;;  %s48_s28 = int_to_ptr.vmem [resolvable:$true] %s47_s28 }
   0x7   :  { %50 = dma.hbm_to_vmem [thread:$0]  %s46_s26, 48, %s48_s28, [#allocation10]  }
   0x8   :  { %s71_s10 = sshll.u32 %s1680_s9, 4  ;;  %s23_s13 = sshll.u32 %s2400_s0, 4  ;;  %s72_s10 = int_to_ptr.vmem [resolvable:$true] %s71_s10  ;;  %s24_s13 = int_to_ptr.hbm [resolvable:$true] %s23_s13 }
   0x9   :  { %74 = dma.hbm_to_vmem [thread:$0]  %s70_s8, 16, %s72_s10, [#allocation13]  }
   0xa   :  { %s31_s15 = sshll.u32 %s2401_s1, 4  ;;  %s1681_s16 = smov [#allocation4]   ;;  %s32_s15 = int_to_ptr.hbm [resolvable:$true] %s31_s15 }
   0xb   :  { %26 = dma.hbm_to_smem %s24_s13, 16, %s1681_s16, [#allocation7]  }
   0xc   :  { %s1682_s17 = smov [#allocation8]   ;;  %s1683_s18 = smov 384  }
   0xd   :  { %s33_s4 = sshll.u32 %s1682_s17, 4  ;;  %s1684_s19 = smov 24   ;;  %s34_s4 = int_to_ptr.vmem [resolvable:$true] %s33_s4 }
   0xe   :  { %39 = dma.hbm_to_vmem [thread:$0]  %s32_s15, 96000, %s34_s4, [#allocation5], %s1683_s18, %s1683_s18, %s1684_s19  }
   0xf   :  { %s55_s0 = sshll.u32 %s2403_s3, 4  ;;  %s1685_s22 = smov [#allocation11]   ;;  %s56_s0 = int_to_ptr.hbm [resolvable:$true] %s55_s0 }
  0x10   :  { %s57_s23 = sshll.u32 %s1685_s22, 4  ;;  %s79_s1 = sshll.u32 %s2405_s5, 4  ;;  %s58_s23 = int_to_ptr.vmem [resolvable:$true] %s57_s23  ;;  %s80_s1 = int_to_ptr.hbm [resolvable:$true] %s79_s1 }
  0x11   :  { %63 = dma.hbm_to_vmem [thread:$0]  %s56_s0, 6144, %s58_s23, [#allocation10], %s1683_s18, %s1683_s18, %s1684_s19  }
  0x12   :  { %s1686_s26 = smov [#allocation14]   ;;  %s1687_s28 = smov 128  }
  0x13   :  { %s81_s27 = sshll.u32 %s1686_s26, 4  ;;  %s1688_s29 = smov 8   ;;  %s82_s27 = int_to_ptr.vmem [resolvable:$true] %s81_s27 }
  0x14   :  { %87 = dma.hbm_to_vmem [thread:$0]  %s80_s1, 2048, %s82_s27, [#allocation13], %s1687_s28, %s1687_s28, %s1688_s29  }
  0x15   :  { %s93_s3 = sshll.u32 %s2406_s6, 4  ;;  %s1689_s9 = smov [#allocation15]   ;;  %s94_s3 = int_to_ptr.hbm [resolvable:$true] %s93_s3 }
  0x16   :  { %s95_s10 = sshll.u32 %s1689_s9, 4  ;;  %s96_s10 = int_to_ptr.vmem [resolvable:$true] %s95_s10 }
  0x17   :  { %98 = dma.hbm_to_vmem [thread:$0]  %s94_s3, 16, %s96_s10, [#allocation16]  }
  0x18   :  { %1667 = dma.done.wait [#allocation7], 16  }
  0x19   :  { %1668 = vsyncadd [#allocation7], 4294967280 }
  0x1a   :  { %1669 = dma.done.wait [#allocation5], 96000  }
  0x1b   :  { %1670 = vsyncadd [#allocation5], 4294871296 }
  0x1c   :  { %1671 = dma.done.wait [#allocation10], 6192  }
  0x1d   :  { %1672 = vsyncadd [#allocation10], 4294961104 }
  0x1e   :  { %1673 = dma.done.wait [#allocation13], 2064  }
  0x1f   :  { %1674 = vsyncadd [#allocation13], 4294965232 }
  0x20   :  { %1675 = dma.done.wait [#allocation16], 16  }
  0x21   :  { %1676 = vsyncadd [#allocation16], 4294967280 }
  0x22   :  { %127 = sfence }
  0x23   :  { %v1753_v0 = vld [vmem:[#allocation11 + $0x168] sm:$0xff]  ;;  %v1755_v1 = vld [vmem:[#allocation11 + $0x170] sm:$0xff]  ;;  %s1759_s5 = sld [smem:[#allocation4]]  ;;  %v1763_v3 = vld [vmem:[#allocation11 + $0x158] sm:$0xff]  ;;  %v2408_v19 = vlaneseq  ;;  %v2432_v28 = vmov 0  ;;  %v1690_v49 = vmov 0.0  }
  0x24   :  { %v1757_v2 = vld [vmem:[#allocation11 + $0x150] sm:$0xff]  ;;  %293 = vmatpush.msra.mxu0 %v1753_v0  ;;  %313 = vmatpush.msra.mxu1 %v1755_v1  ;;  %v1765_v4 = vld [vmem:[#allocation11 + $0x138] sm:$0xff]  ;;  %v1767_v5 = vld [vmem:[#allocation11 + $0x140] sm:$0xff]  ;;  %s1309_s14 = sld [smem:[#allocation4 + $0x1]] }
  0x25   :  { %407 = vmatpush.msra.mxu3 %v1753_v0  ;;  %v1772_v6 = vld [vmem:[#allocation11 + $0x120] sm:$0xff]  ;;  %v1774_v7 = vld [vmem:[#allocation11 + $0x128] sm:$0xff]  ;;  %v1781_v9 = vld [vmem:[#allocation11 + $0x110] sm:$0xff]  ;;  %vm1837_vm0 = vcmp.lt.s32.totalorder %v2408_v19, 384  ;;  %s1311_s19 = sld [smem:[#allocation4 + $0x2]] }
  0x26   :  { %294 = vmatpush.msra.mxu0 %v1757_v2  ;;  %314 = vmatpush.msra.mxu1 %v1763_v3  ;;  %v1779_v8 = vld [vmem:[#allocation11 + $0x108] sm:$0xff]  ;;  %v1788_v10 = vld [vmem:[#allocation11 + $0xf0] sm:$0xff]  ;;  %v1790_v11 = vld [vmem:[#allocation11 + $0xf8] sm:$0xff]  ;;  %v2433_v28 = vsel %vm1837_vm0, 4294967295, %v2432_v28  ;;  %s1313_s24 = sld [smem:[#allocation4 + $0x3]] }
  0x27   :  { %408 = vmatpush.msra.mxu3 %v1757_v2  ;;  %v1792_v12 = vld [vmem:[#allocation11 + $0x178] sm:$0xff]  ;;  %v1797_v13 = vld [vmem:[#allocation11 + $0x160] sm:$0xff]  ;;  %v1807_v16 = vld [vmem:[#allocation11 + $0x148] sm:$0xff]  ;;  %2434 = vst [vmem:[#allocation25_spill] sm:$0xff] %v2433_v28  ;;  %s1315_s29 = sld [smem:[#allocation4 + $0x4]] }
  0x28   :  { %295 = vmatpush.msra.mxu0 %v1765_v4  ;;  %315 = vmatpush.msra.mxu1 %v1767_v5  ;;  %v1799_v14 = vld [vmem:[#allocation11 + $0xd8] sm:$0xff]  ;;  %v1801_v15 = vld [vmem:[#allocation11 + $0xe0] sm:$0xff]  ;;  %v1811_v18 = vld [vmem:[#allocation11 + $0xc8] sm:$0xff] }
  0x29   :  { %s130_s6 = sshra.s32 %s1759_s5, 3  ;;  %409 = vmatpush.msra.mxu3 %v1765_v4  ;;  %s133_s11 = sand.u32 7, %s1759_s5  ;;  %333 = vmatpush.msra.mxu2 %v1792_v12  ;;  %v1809_v17 = vld [vmem:[#allocation11 + $0xc0] sm:$0xff]  ;;  %v1817_v20 = vld [vmem:[#allocation11 + $0x130] sm:$0xff]  ;;  %v1819_v21 = vld [vmem:[#allocation11 + $0xa8] sm:$0xff] }
  0x2a   :  { %296 = vmatpush.msra.mxu0 %v1772_v6  ;;  %316 = vmatpush.msra.mxu1 %v1774_v7  ;;  %s1308_s12 = smul.u32 24, %s130_s6  ;;  %v1821_v22 = vld [vmem:[#allocation11 + $0xb0] sm:$0xff]  ;;  %v1829_v24 = vld [vmem:[#allocation11 + $0x98] sm:$0xff]  ;;  %v1844_v29 = vld [vmem:[#allocation11 + $0x100] sm:$0xff]  ;;  %s147_s15 = sshra.s32 %s1309_s14, 3 }
  0x2b   :  { %410 = vmatpush.msra.mxu3 %v1772_v6  ;;  %334 = vmatpush.msra.mxu2 %v1797_v13  ;;  %v1827_v23 = vld [vmem:[#allocation11 + $0x90] sm:$0xff]  ;;  %v1831_v25 = vld [vmem:[#allocation11 + $0x118] sm:$0xff]  ;;  %v1849_v32 = vld [vmem:[#allocation11 + $0x80] sm:$0xff]  ;;  %s1310_s16 = smul.u32 24, %s147_s15  ;;  %s150_s17 = sand.u32 7, %s1309_s14 }
  0x2c   :  { %297 = vmatpush.msra.mxu0 %v1779_v8  ;;  %317 = vmatpush.msra.mxu1 %v1781_v9  ;;  %s136_s13 = sadd.s32 %s1308_s12, %s133_s11  ;;  %v1834_v26 = vld [vmem:[#allocation9] sm:$0x7]  ;;  %v1855_v33 = vld [vmem:[#allocation11 + $0xe8] sm:$0xff]  ;;  %v1859_v34 = vld [vmem:[#allocation11 + $0x60] sm:$0xff]  ;;  %s161_s20 = sshra.s32 %s1311_s19, 3 }
  0x2d   :  { %411 = vmatpush.msra.mxu3 %v1779_v8  ;;  %335 = vmatpush.msra.mxu2 %v1807_v16  ;;  %2431 = vst [vmem:[#allocation24_spill] sm:$0xff] %v1834_v26  ;;  %s137_s2 = scalar_lea.vmem [#allocation8], %s136_s13  ;;  %v1847_v31 = vld [vmem:[#allocation11 + $0x78] sm:$0xff]  ;;  %v1861_v35 = vld [vmem:[#allocation11 + $0x68] sm:$0xff]  ;;  %v1867_v36 = vld [vmem:[#allocation11 + $0xd0] sm:$0xff]  ;;  %s153_s4 = sadd.s32 %s1310_s16, %s150_s17 }
  0x2e   :  { %298 = vmatpush.msra.mxu0 %v1788_v10  ;;  %318 = vmatpush.msra.mxu1 %v1790_v11  ;;  %v138_v27 = vld [vmem:[%s137_s2] ss:$8 sm:$0x7]  ;;  %v1887_v42 = vld [vmem:[#allocation11 + $0xa0] sm:$0xff]  ;;  %s154_s18 = scalar_lea.vmem [#allocation8], %s153_s4  ;;  %s1312_s21 = smul.u32 24, %s161_s20 }
  0x2f   :  { %412 = vmatpush.msra.mxu3 %v1788_v10  ;;  %336 = vmatpush.msra.mxu2 %v1817_v20  ;;  %v139_v30 = vadd.f32 %v138_v27, %v1834_v26  ;;  %v1869_v37 = vld [vmem:[#allocation11 + $0x48] sm:$0xff]  ;;  %v1871_v38 = vld [vmem:[#allocation11 + $0x50] sm:$0xff]  ;;  %v1877_v39 = vld [vmem:[#allocation11 + $0xb8] sm:$0xff]  ;;  %s164_s0 = sand.u32 7, %s1311_s19  ;;  %s175_s25 = sshra.s32 %s1313_s24, 3 }
  0x30   :  { %299 = vmatpush.msra.mxu0 %v1799_v14  ;;  %319 = vmatpush.msra.mxu1 %v1801_v15  ;;  %v1879_v40 = vld [vmem:[#allocation11 + $0x30] sm:$0xff]  ;;  %v1881_v41 = vld [vmem:[#allocation11 + $0x38] sm:$0xff]  ;;  %v1891_v44 = vld [vmem:[#allocation11 + $0x20] sm:$0xff]  ;;  %s167_s22 = sadd.s32 %s1312_s21, %s164_s0  ;;  %s1314_s1 = smul.u32 24, %s175_s25 }
  0x31   :  { %413 = vmatpush.msra.mxu3 %v1799_v14  ;;  %337 = vmatpush.msra.mxu2 %v1831_v25  ;;  %144 = vst.msk [vmem:[#allocation2] ss:$8 sm:$0x7] %vm1837_vm0, %v139_v30  ;;  %v1889_v43 = vld [vmem:[#allocation11 + $0x18] sm:$0xff]  ;;  %v1897_v45 = vld [vmem:[#allocation11 + $0x88] sm:$0xff]  ;;  %v1899_v46 = vld [vmem:[#allocation11] sm:$0xff] }
  0x32   :  { %300 = vmatpush.msra.mxu0 %v1809_v17  ;;  %320 = vmatpush.msra.mxu1 %v1811_v18  ;;  %2435 = vst [vmem:[#allocation26_spill] sm:$0xff] %v1879_v40  ;;  %v1901_v47 = vld [vmem:[#allocation11 + $0x8] sm:$0xff]  ;;  %v1908_v48 = vld [vmem:[#allocation11 + $0x70] sm:$0xff]  ;;  %v1913_v50 = vld [vmem:[#allocation11 + $0x58] sm:$0xff]  ;;  %s168_s23 = scalar_lea.vmem [#allocation8], %s167_s22  ;;  %s178_s26 = sand.u32 7, %s1313_s24 }
  0x33   :  { %414 = vmatpush.msra.mxu3 %v1809_v17  ;;  %338 = vmatpush.msra.mxu2 %v1844_v29  ;;  %2436 = vst [vmem:[#allocation27_spill] sm:$0xff] %v1881_v41  ;;  %v1917_v51 = vld [vmem:[#allocation11 + $0x40] sm:$0xff]  ;;  %v1923_v52 = vld [vmem:[#allocation11 + $0x28] sm:$0xff]  ;;  %v1929_v53 = vld [vmem:[#allocation11 + $0x10] sm:$0xff]  ;;  %s181_s27 = sadd.s32 %s1314_s1, %s178_s26  ;;  %s189_s30 = sshra.s32 %s1315_s29, 3 }
  0x34   :  { %301 = vmatpush.msra.mxu0 %v1819_v21  ;;  %321 = vmatpush.msra.mxu1 %v1821_v22  ;;  %2437 = vst [vmem:[#allocation28_spill] sm:$0xff] %v1889_v43  ;;  %s182_s28 = scalar_lea.vmem [#allocation8], %s181_s27  ;;  %s1316_s8 = smul.u32 24, %s189_s30 }
  0x35   :  { %415 = vmatpush.msra.mxu3 %v1819_v21  ;;  %339 = vmatpush.msra.mxu2 %v1855_v33  ;;  %2438 = vst [vmem:[#allocation29_spill] sm:$0xff] %v1891_v44  ;;  %s192_s3 = sand.u32 7, %s1315_s29  ;;  %s1317_s5 = sld [smem:[#allocation4 + $0x5]] }
  0x36   :  { %302 = vmatpush.msra.mxu0 %v1827_v23  ;;  %322 = vmatpush.msra.mxu1 %v1829_v24  ;;  %2439 = vst [vmem:[#allocation30_spill] sm:$0xff] %v1899_v46  ;;  %s195_s9 = sadd.s32 %s1316_s8, %s192_s3  ;;  %s1319_s14 = sld [smem:[#allocation4 + $0x6]] }
  0x37   :  { %416 = vmatpush.msra.mxu3 %v1827_v23  ;;  %340 = vmatpush.msra.mxu2 %v1867_v36  ;;  %2440 = vst [vmem:[#allocation31_spill] sm:$0xff] %v1901_v47  ;;  %s196_s10 = scalar_lea.vmem [#allocation8], %s195_s9  ;;  %s1321_s19 = sld [smem:[#allocation4 + $0x7]] }
  0x38   :  { %303 = vmatpush.msra.mxu0 %v1847_v31  ;;  %323 = vmatpush.msra.mxu1 %v1849_v32  ;;  %2441 = vst [vmem:[#allocation32_spill] sm:$0xff] %v1917_v51  ;;  %v353_v54 = vld [vmem:[#allocation2] ss:$8 sm:$0x7]  ;;  %s1691_s24 = smov [#allocation17]   ;;  %s1270_s27 = sshll.u32 %s2407_s7, 4  ;;  %s1271_s27 = int_to_ptr.hbm [resolvable:$true] %s1270_s27 }
  0x39   :  { %417 = vmatpush.msra.mxu3 %v1847_v31  ;;  %341 = vmatpush.msra.mxu2 %v1877_v39  ;;  %2442 = vst [vmem:[#allocation33_spill] sm:$0xff] %v1923_v52  ;;  %v375_v55 = vrot.slane %v353_v54, 1  ;;  %v399_v28 = vrot.slane %v353_v54, 2  ;;  %s1268_s25 = sshll.u32 %s1691_s24, 4  ;;  %s1269_s25 = int_to_ptr.vmem [resolvable:$true] %s1268_s25 }
  0x3a   :  { %304 = vmatpush.msra.mxu0 %v1859_v34  ;;  %324 = vmatpush.msra.mxu1 %v1861_v35  ;;  %2443 = vst [vmem:[#allocation34_spill] sm:$0xff] %v1929_v53 }
  0x3b   :  { %418 = vmatpush.msra.mxu3 %v1859_v34  ;;  %342 = vmatpush.msra.mxu2 %v1887_v42  ;;  %s203_s6 = sshra.s32 %s1317_s5, 3  ;;  %s206_s12 = sand.u32 7, %s1317_s5 }
  0x3c   :  { %305 = vmatpush.msra.mxu0 %v1869_v37  ;;  %325 = vmatpush.msra.mxu1 %v1871_v38  ;;  %s1318_s11 = smul.u32 24, %s203_s6  ;;  %s217_s15 = sshra.s32 %s1319_s14, 3 }
  0x3d   :  { %419 = vmatpush.msra.mxu3 %v1869_v37  ;;  %343 = vmatpush.msra.mxu2 %v1897_v45  ;;  %s1320_s16 = smul.u32 24, %s217_s15  ;;  %s220_s17 = sand.u32 7, %s1319_s14 }
  0x3e   :  { %306 = vmatpush.msra.mxu0 %v1879_v40  ;;  %326 = vmatpush.msra.mxu1 %v1881_v41  ;;  %s209_s13 = sadd.s32 %s1318_s11, %s206_s12  ;;  %s231_s20 = sshra.s32 %s1321_s19, 3 }
  0x3f   :  { %420 = vmatpush.msra.mxu3 %v1879_v40  ;;  %344 = vmatpush.msra.mxu2 %v1908_v48  ;;  %s210_s2 = scalar_lea.vmem [#allocation8], %s209_s13  ;;  %s223_s4 = sadd.s32 %s1320_s16, %s220_s17 }
  0x40   :  { %307 = vmatpush.msra.mxu0 %v1889_v43  ;;  %327 = vmatpush.msra.mxu1 %v1891_v44  ;;  %s1322_s21 = smul.u32 24, %s231_s20  ;;  %s234_s0 = sand.u32 7, %s1321_s19 }
  0x41   :  { %421 = vmatpush.msra.mxu3 %v1889_v43  ;;  %345 = vmatpush.msra.mxu2 %v1913_v50 }
  0x42   :  { %308 = vmatpush.msra.mxu0 %v1899_v46  ;;  %328 = vmatpush.msra.mxu1 %v1901_v47  ;;  %s237_s22 = sadd.s32 %s1322_s21, %s234_s0 }
  0x43   :  { %309 = vmatmul.f32.vlgmr.msra.gmra.mxu0 %v1690_v49  ;;  %329 = vmatmul.f32.vlgmr.msra.gmra.mxu1 %v1690_v49 }
  0x44   :  { %427 = vmatpush.msrb.mxu0 %v1755_v1  ;;  %447 = vmatpush.msrb.mxu1 %v1792_v12 }
  0x45   :  { %422 = vmatpush.msra.mxu3 %v1899_v46  ;;  %346 = vmatpush.msra.mxu2 %v1917_v51 }
  0x46   :  { %428 = vmatpush.msrb.mxu0 %v1763_v3  ;;  %448 = vmatpush.msrb.mxu1 %v1797_v13 }
  0x47   :  { %541 = vmatpush.msrb.mxu3 %v1755_v1  ;;  %347 = vmatpush.msra.mxu2 %v1923_v52 }
  0x48   :  { %429 = vmatpush.msrb.mxu0 %v1767_v5  ;;  %449 = vmatpush.msrb.mxu1 %v1807_v16 }
  0x49   :  { %542 = vmatpush.msrb.mxu3 %v1763_v3  ;;  %348 = vmatpush.msra.mxu2 %v1929_v53 }
  0x4a   :  { %430 = vmatpush.msrb.mxu0 %v1774_v7  ;;  %450 = vmatpush.msrb.mxu1 %v1817_v20 }
  0x4b   :  { %543 = vmatpush.msrb.mxu3 %v1767_v5  ;;  %349 = vmatmul.f32.vlgmr.msra.gmra.mxu2 %v1690_v49  ;;  %v155_v49 = vld [vmem:[%s154_s18] ss:$8 sm:$0x7]  ;;  %s224_s18 = scalar_lea.vmem [#allocation8], %s223_s4 }
  0x4c   :  { %431 = vmatpush.msrb.mxu0 %v1781_v9  ;;  %451 = vmatpush.msrb.mxu1 %v1831_v25  ;;  %v156_v19 = vadd.f32 %v155_v49, %v1834_v26 }
  0x4d   :  { %521 = vmatpush.msrb.mxu2 %v1753_v0  ;;  %544 = vmatpush.msrb.mxu3 %v1774_v7 }
  0x4e   :  { %432 = vmatpush.msrb.mxu0 %v1790_v11  ;;  %452 = vmatpush.msrb.mxu1 %v1844_v29  ;;  %158 = vst.msk [vmem:[#allocation2 + $0x1] ss:$8 sm:$0x7] %vm1837_vm0, %v156_v19 }
  0x4f   :  { %522 = vmatpush.msrb.mxu2 %v1757_v2  ;;  %545 = vmatpush.msrb.mxu3 %v1781_v9 }
  0x50   :  { %433 = vmatpush.msrb.mxu0 %v1801_v15  ;;  %453 = vmatpush.msrb.mxu1 %v1855_v33 }
  0x51   :  { %523 = vmatpush.msrb.mxu2 %v1765_v4  ;;  %546 = vmatpush.msrb.mxu3 %v1790_v11 }
  0x52   :  { %434 = vmatpush.msrb.mxu0 %v1811_v18  ;;  %454 = vmatpush.msrb.mxu1 %v1867_v36 }
  0x53   :  { %524 = vmatpush.msrb.mxu2 %v1772_v6  ;;  %547 = vmatpush.msrb.mxu3 %v1801_v15 }
  0x54   :  { %435 = vmatpush.msrb.mxu0 %v1821_v22  ;;  %455 = vmatpush.msrb.mxu1 %v1877_v39 }
  0x55   :  { %525 = vmatpush.msrb.mxu2 %v1779_v8  ;;  %548 = vmatpush.msrb.mxu3 %v1811_v18 }
  0x56   :  { %436 = vmatpush.msrb.mxu0 %v1829_v24  ;;  %456 = vmatpush.msrb.mxu1 %v1887_v42 }
  0x57   :  { %526 = vmatpush.msrb.mxu2 %v1788_v10  ;;  %549 = vmatpush.msrb.mxu3 %v1821_v22 }
  0x58   :  { %437 = vmatpush.msrb.mxu0 %v1849_v32  ;;  %457 = vmatpush.msrb.mxu1 %v1897_v45 }
  0x59   :  { %527 = vmatpush.msrb.mxu2 %v1799_v14  ;;  %550 = vmatpush.msrb.mxu3 %v1829_v24 }
  0x5a   :  { %438 = vmatpush.msrb.mxu0 %v1861_v35  ;;  %458 = vmatpush.msrb.mxu1 %v1908_v48 }
  0x5b   :  { %528 = vmatpush.msrb.mxu2 %v1809_v17  ;;  %551 = vmatpush.msrb.mxu3 %v1849_v32 }
  0x5c   :  { %439 = vmatpush.msrb.mxu0 %v1871_v38  ;;  %459 = vmatpush.msrb.mxu1 %v1913_v50 }
  0x5d   :  { %529 = vmatpush.msrb.mxu2 %v1819_v21  ;;  %552 = vmatpush.msrb.mxu3 %v1861_v35 }
  0x5e   :  { %440 = vmatpush.msrb.mxu0 %v1881_v41  ;;  %460 = vmatpush.msrb.mxu1 %v1917_v51 }
  0x5f   :  { %530 = vmatpush.msrb.mxu2 %v1827_v23  ;;  %553 = vmatpush.msrb.mxu3 %v1871_v38 }
  0x60   :  { %441 = vmatpush.msrb.mxu0 %v1891_v44  ;;  %461 = vmatpush.msrb.mxu1 %v1923_v52 }
  0x61   :  { %531 = vmatpush.msrb.mxu2 %v1847_v31  ;;  %554 = vmatpush.msrb.mxu3 %v1881_v41 }
  0x62   :  { %442 = vmatpush.msrb.mxu0 %v1901_v47  ;;  %462 = vmatpush.msrb.mxu1 %v1929_v53 }
  0x63   :  { %532 = vmatpush.msrb.mxu2 %v1859_v34  ;;  %555 = vmatpush.msrb.mxu3 %v1891_v44 }
  0x64   :  { %561 = vmatpush.msra.mxu0 %v1792_v12  ;;  %635 = vmatpush.msra.mxu1 %v1753_v0 }
  0x65   :  { %533 = vmatpush.msrb.mxu2 %v1869_v37  ;;  %556 = vmatpush.msrb.mxu3 %v1901_v47 }
  0x66   :  { %562 = vmatpush.msra.mxu0 %v1797_v13  ;;  %636 = vmatpush.msra.mxu1 %v1757_v2 }
  0x67   :  { %534 = vmatpush.msrb.mxu2 %v1879_v40 }
  0x68   :  { %563 = vmatpush.msra.mxu0 %v1807_v16  ;;  %637 = vmatpush.msra.mxu1 %v1765_v4 }
  0x69   :  { %535 = vmatpush.msrb.mxu2 %v1889_v43 }
  0x6a   :  { %564 = vmatpush.msra.mxu0 %v1817_v20  ;;  %638 = vmatpush.msra.mxu1 %v1772_v6 }
  0x6b   :  { %536 = vmatpush.msrb.mxu2 %v1899_v46 }
  0x6c   :  { %565 = vmatpush.msra.mxu0 %v1831_v25  ;;  %639 = vmatpush.msra.mxu1 %v1779_v8 }
  0x6d   :  { %655 = vmatpush.msra.mxu2 %v1755_v1 }
  0x6e   :  { %566 = vmatpush.msra.mxu0 %v1844_v29  ;;  %640 = vmatpush.msra.mxu1 %v1788_v10 }
  0x6f   :  { %656 = vmatpush.msra.mxu2 %v1763_v3 }
  0x70   :  { %567 = vmatpush.msra.mxu0 %v1855_v33  ;;  %641 = vmatpush.msra.mxu1 %v1799_v14 }
  0x71   :  { %657 = vmatpush.msra.mxu2 %v1767_v5 }
  0x72   :  { %568 = vmatpush.msra.mxu0 %v1867_v36  ;;  %642 = vmatpush.msra.mxu1 %v1809_v17 }
  0x73   :  { %658 = vmatpush.msra.mxu2 %v1774_v7 }
  0x74   :  { %569 = vmatpush.msra.mxu0 %v1877_v39  ;;  %643 = vmatpush.msra.mxu1 %v1819_v21 }
  0x75   :  { %659 = vmatpush.msra.mxu2 %v1781_v9 }
  0x76   :  { %570 = vmatpush.msra.mxu0 %v1887_v42  ;;  %644 = vmatpush.msra.mxu1 %v1827_v23 }
  0x77   :  { %660 = vmatpush.msra.mxu2 %v1790_v11 }
  0x78   :  { %571 = vmatpush.msra.mxu0 %v1897_v45  ;;  %645 = vmatpush.msra.mxu1 %v1847_v31 }
  0x79   :  { %661 = vmatpush.msra.mxu2 %v1801_v15 }
  0x7a   :  { %572 = vmatpush.msra.mxu0 %v1908_v48  ;;  %646 = vmatpush.msra.mxu1 %v1859_v34 }
  0x7b   :  { %662 = vmatpush.msra.mxu2 %v1811_v18 }
  0x7c   :  { %573 = vmatpush.msra.mxu0 %v1913_v50  ;;  %647 = vmatpush.msra.mxu1 %v1869_v37 }
  0x7d   :  { %663 = vmatpush.msra.mxu2 %v1821_v22 }
  0x7e   :  { %574 = vmatpush.msra.mxu0 %v1917_v51  ;;  %648 = vmatpush.msra.mxu1 %v1879_v40 }
  0x7f   :  { %664 = vmatpush.msra.mxu2 %v1829_v24 }
  0x80   :  { %575 = vmatpush.msra.mxu0 %v1923_v52  ;;  %649 = vmatpush.msra.mxu1 %v1889_v43 }
  0x81   :  { %665 = vmatpush.msra.mxu2 %v1849_v32 }
  0x82   :  { %576 = vmatpush.msra.mxu0 %v1929_v53  ;;  %650 = vmatpush.msra.mxu1 %v1899_v46 }
  0x83   :  { %666 = vmatpush.msra.mxu2 %v1861_v35 }
  0x85   :  { %667 = vmatpush.msra.mxu2 %v1871_v38 }
  0x87   :  { %668 = vmatpush.msra.mxu2 %v1881_v41 }
  0x89   :  { %669 = vmatpush.msra.mxu2 %v1891_v44 }
  0x8b   :  { %670 = vmatpush.msra.mxu2 %v1901_v47 }
  0xc0   :  { %v310_v56 = vpop.f32.mrf.mxu0  ;;  %v330_v57 = vpop.f32.mrf.mxu1 }
  0xc1   :  { %v354_v58 = vadd.f32 %v353_v54, %v310_v56  ;;  %v377_v59 = vadd.f32 %v375_v55, %v330_v57 }
  0xc3   :  { %v1323_v60 = vmul.f32 -1.442695, %v354_v58  ;;  %v1324_v61 = vmul.f32 -1.442695, %v377_v59 }
  0xc5   :  { %1353 = vpow2.f32 %v1323_v60  ;;  %v2042_v60 = vld [vmem:[#allocation12] sm:$0x1] }
  0xc6   :  { %1355 = vpow2.f32 %v1324_v61 }
  0xcb   :  { %v1354_v62 = vpop.eup %1353 }
  0xcc   :  { %v1356_v63 = vpop.eup %1355  ;;  %v358_v27 = vadd.f32 1.0, %v1354_v62 }
  0xcd   :  { %v381_v30 = vadd.f32 1.0, %v1356_v63 }
  0xce   :  { %1357 = vrcp.f32 %v358_v27  ;;  %v350_v61 = vpop.f32.mrf.mxu2  ;;  %v370_v47 = vand.u32 2147483648, %v358_v27  ;;  %v368_v63 = vand.u32 2147483647, %v358_v27  ;;  %vm364_vm2 = vweird.f32 %v358_v27 }
  0xcf   :  { %1359 = vrcp.f32 %v381_v30  ;;  %v397_v53 = vadd.f32 %v350_v61, %v2042_v60  ;;  %vm387_vm5 = vweird.f32 %v381_v30  ;;  %v393_v41 = vand.u32 2147483648, %v381_v30 }
  0xd0   :  { %v371_v26 = vor.u32 1.1754944e-38, %v370_v47  ;;  %vm369_vm4 = vcmp.eq.f32.partialorder %v368_v63, 8.507059e+37  ;;  %v391_v40 = vand.u32 2147483647, %v381_v30 }
  0xd2   :  { %vm392_vm8 = vcmp.eq.f32.partialorder %v391_v40, 8.507059e+37  ;;  %v2446_v40 = vld [vmem:[#allocation33_spill] sm:$0xff] }
  0xd4   :  { %v1358_v56 = vpop.eup %1357 }
  0xd5   :  { %v1360_v55 = vpop.eup %1359  ;;  %v360_v57 = vmul.f32 %v1358_v56, %v358_v27  ;;  %vm365_vm1 = vweird.f32 %v1358_v56  ;;  %v394_v27 = vor.u32 1.1754944e-38, %v393_v41  ;;  %v2447_v41 = vld [vmem:[#allocation28_spill] sm:$0xff] }
  0xd6   :  { %v383_v59 = vmul.f32 %v1360_v55, %v381_v30  ;;  %vm366_vm3 = vmor %vm364_vm2, %vm365_vm1  ;;  %vm388_vm6 = vweird.f32 %v1360_v55  ;;  %v467_v30 = vld [vmem:[#allocation2 + $0x1] ss:$8 sm:$0x7] }
  0xd7   :  { %v361_v58 = vsub.f32 1.0, %v360_v57  ;;  %vm389_vm7 = vmor %vm387_vm5, %vm388_vm6 }
  0xd8   :  { %v384_v49 = vsub.f32 1.0, %v383_v59 }
  0xd9   :  { %v362_v62 = vmul.f32 %v1358_v56, %v361_v58 }
  0xda   :  { %v385_v43 = vmul.f32 %v1360_v55, %v384_v49 }
  0xdb   :  { %v363_v46 = vadd.f32 %v1358_v56, %v362_v62 }
  0xdc   :  { %v386_v58 = vadd.f32 %v1360_v55, %v385_v43  ;;  %v2448_v43 = vld [vmem:[#allocation29_spill] sm:$0xff] }
  0xdd   :  { %v367_v19 = vsel %vm366_vm3, %v1358_v56, %v363_v46  ;;  %v489_v56 = vrot.slane %v467_v30, 1 }
  0xde   :  { %v372_v44 = vsel %vm369_vm4, %v371_v26, %v367_v19  ;;  %v390_v61 = vsel %vm389_vm7, %v1360_v55, %v386_v58  ;;  %v2444_v26 = vld [vmem:[#allocation26_spill] sm:$0xff] }
  0xdf   :  { %v398_v57 = vmul.f32 %v397_v53, %v372_v44  ;;  %v395_v47 = vsel %vm392_vm8, %v394_v27, %v390_v61  ;;  %v2449_v44 = vld [vmem:[#allocation34_spill] sm:$0xff]  ;;  %v2451_v53 = vld [vmem:[#allocation31_spill] sm:$0xff] }
  0xe1   :  { %v401_v52 = vadd.f32 %v399_v28, %v398_v57  ;;  %v2445_v28 = vld [vmem:[#allocation27_spill] sm:$0xff] }
  0xe3   :  { %1361 = vtanh.f32 %v401_v52  ;;  %v2450_v52 = vld [vmem:[#allocation30_spill] sm:$0xff] }
  0xe9   :  { %v1362_v59 = vpop.eup %1361 }
  0xea   :  { %v403_v62 = vsub.f32 0.0, %v1362_v59 }
  0xec   :  { %v404_v54 = vmul.f32 %v403_v62, %v395_v47 }
  0xee   :  { %v2045_v46 = vadd.f32 %v1362_v59, %v404_v54 }
  0xf0   :  { %406 = vst [vmem:[#allocation3] sm:$0x1] %v2045_v46  ;;  %423 = vmatmul.f32.vlgmr.msra.gmra.mxu3 %v2045_v46  ;;  %443 = vmatmul.f32.vlgmr.msrb.gmra.mxu0 %v2045_v46 }
  0xf1   :  { %463 = vmatmul.f32.vlgmr.msrb.gmra.mxu1 %v2045_v46  ;;  %675 = vmatpush.msra.mxu3 %v1792_v12 }
  0xf2   :  { %749 = vmatpush.msrb.mxu0 %v1753_v0  ;;  %769 = vmatpush.msrb.mxu1 %v1755_v1 }
  0xf3   :  { %676 = vmatpush.msra.mxu3 %v1797_v13 }
  0xf4   :  { %750 = vmatpush.msrb.mxu0 %v1757_v2  ;;  %770 = vmatpush.msrb.mxu1 %v1763_v3 }
  0xf5   :  { %677 = vmatpush.msra.mxu3 %v1807_v16 }
  0xf6   :  { %751 = vmatpush.msrb.mxu0 %v1765_v4  ;;  %771 = vmatpush.msrb.mxu1 %v1767_v5 }
  0xf7   :  { %678 = vmatpush.msra.mxu3 %v1817_v20 }
  0xf8   :  { %752 = vmatpush.msrb.mxu0 %v1772_v6  ;;  %772 = vmatpush.msrb.mxu1 %v1774_v7 }
  0xf9   :  { %679 = vmatpush.msra.mxu3 %v1831_v25 }
  0xfa   :  { %753 = vmatpush.msrb.mxu0 %v1779_v8  ;;  %773 = vmatpush.msrb.mxu1 %v1781_v9 }
  0xfb   :  { %680 = vmatpush.msra.mxu3 %v1844_v29 }
  0xfc   :  { %754 = vmatpush.msrb.mxu0 %v1788_v10  ;;  %774 = vmatpush.msrb.mxu1 %v1790_v11 }
  0xfd   :  { %681 = vmatpush.msra.mxu3 %v1855_v33 }
  0xfe   :  { %755 = vmatpush.msrb.mxu0 %v1799_v14  ;;  %775 = vmatpush.msrb.mxu1 %v1801_v15 }
  0xff   :  { %682 = vmatpush.msra.mxu3 %v1867_v36 }
 0x100   :  { %756 = vmatpush.msrb.mxu0 %v1809_v17  ;;  %776 = vmatpush.msrb.mxu1 %v1811_v18 }
 0x101   :  { %683 = vmatpush.msra.mxu3 %v1877_v39 }
 0x102   :  { %757 = vmatpush.msrb.mxu0 %v1819_v21  ;;  %777 = vmatpush.msrb.mxu1 %v1821_v22 }
 0x103   :  { %684 = vmatpush.msra.mxu3 %v1887_v42 }
 0x104   :  { %758 = vmatpush.msrb.mxu0 %v1827_v23  ;;  %778 = vmatpush.msrb.mxu1 %v1829_v24 }
 0x105   :  { %685 = vmatpush.msra.mxu3 %v1897_v45 }
 0x106   :  { %759 = vmatpush.msrb.mxu0 %v1847_v31  ;;  %779 = vmatpush.msrb.mxu1 %v1849_v32 }
 0x107   :  { %686 = vmatpush.msra.mxu3 %v1908_v48 }
 0x108   :  { %760 = vmatpush.msrb.mxu0 %v1859_v34  ;;  %780 = vmatpush.msrb.mxu1 %v1861_v35 }
 0x109   :  { %687 = vmatpush.msra.mxu3 %v1913_v50 }
 0x10a   :  { %761 = vmatpush.msrb.mxu0 %v1869_v37  ;;  %781 = vmatpush.msrb.mxu1 %v1871_v38 }
 0x10b   :  { %688 = vmatpush.msra.mxu3 %v1917_v51 }
 0x10c   :  { %762 = vmatpush.msrb.mxu0 %v2444_v26  ;;  %782 = vmatpush.msrb.mxu1 %v2445_v28 }
 0x10d   :  { %689 = vmatpush.msra.mxu3 %v2446_v40 }
 0x10e   :  { %763 = vmatpush.msrb.mxu0 %v2447_v41  ;;  %783 = vmatpush.msrb.mxu1 %v2448_v43 }
 0x10f   :  { %690 = vmatpush.msra.mxu3 %v2449_v44 }
 0x110   :  { %764 = vmatpush.msrb.mxu0 %v2450_v52  ;;  %784 = vmatpush.msrb.mxu1 %v2451_v53 }
 0x16d   :  { %v444_v55 = vpop.f32.mrf.mxu0 }
 0x16e   :  { %v491_v63 = vadd.f32 %v489_v56, %v444_v55  ;;  %v464_v55 = vpop.f32.mrf.mxu1 }
 0x170   :  { %v1326_v49 = vmul.f32 -1.442695, %v491_v63 }
 0x172   :  { %1363 = vpow2.f32 %v1326_v49 }
 0x173   :  { %v424_v19 = vpop.f32.mrf.mxu3 }
 0x174   :  { %v468_v57 = vadd.f32 %v467_v30, %v424_v19 }
 0x176   :  { %v1325_v58 = vmul.f32 -1.442695, %v468_v57  ;;  %v513_v57 = vrot.slane %v467_v30, 2 }
 0x178   :  { %1365 = vpow2.f32 %v1325_v58  ;;  %v1364_v27 = vpop.eup %1363  ;;  %v511_v58 = vadd.f32 %v464_v55, %v2042_v60 }
 0x179   :  { %v495_v59 = vadd.f32 1.0, %v1364_v27 }
 0x17b   :  { %vm501_vm14 = vweird.f32 %v495_v59  ;;  %v505_v51 = vand.u32 2147483647, %v495_v59 }
 0x17d   :  { %vm506_vm1 = vcmp.eq.f32.partialorder %v505_v51, 8.507059e+37 }
 0x17e   :  { %v1366_v61 = vpop.eup %1365 }
 0x17f   :  { %v472_v62 = vadd.f32 1.0, %v1366_v61 }
 0x181   :  { %1367 = vrcp.f32 %v472_v62  ;;  %v484_v43 = vand.u32 2147483648, %v472_v62  ;;  %v482_v56 = vand.u32 2147483647, %v472_v62  ;;  %vm478_vm10 = vweird.f32 %v472_v62 }
 0x182   :  { %1369 = vrcp.f32 %v495_v59 }
 0x183   :  { %v485_v19 = vor.u32 1.1754944e-38, %v484_v43  ;;  %vm483_vm12 = vcmp.eq.f32.partialorder %v482_v56, 8.507059e+37 }
 0x187   :  { %v1368_v47 = vpop.eup %1367 }
 0x188   :  { %v1370_v54 = vpop.eup %1369  ;;  %v474_v52 = vmul.f32 %v1368_v47, %v472_v62  ;;  %vm479_vm9 = vweird.f32 %v1368_v47 }
 0x189   :  { %v497_v44 = vmul.f32 %v1370_v54, %v495_v59  ;;  %vm480_vm11 = vmor %vm478_vm10, %vm479_vm9  ;;  %vm502_vm13 = vweird.f32 %v1370_v54 }
 0x18a   :  { %v475_v53 = vsub.f32 1.0, %v474_v52  ;;  %vm503_vm15 = vmor %vm501_vm14, %vm502_vm13 }
 0x18b   :  { %v498_v49 = vsub.f32 1.0, %v497_v44 }
 0x18c   :  { %v476_v41 = vmul.f32 %v1368_v47, %v475_v53  ;;  %v507_v53 = vand.u32 2147483648, %v495_v59 }
 0x18d   :  { %v499_v28 = vmul.f32 %v1370_v54, %v498_v49 }
 0x18e   :  { %v477_v63 = vadd.f32 %v1368_v47, %v476_v41  ;;  %v508_v62 = vor.u32 1.1754944e-38, %v507_v53 }
 0x18f   :  { %v500_v26 = vadd.f32 %v1370_v54, %v499_v28 }
 0x190   :  { %v481_v27 = vsel %vm480_vm11, %v1368_v47, %v477_v63 }
 0x191   :  { %v486_v61 = vsel %vm483_vm12, %v485_v19, %v481_v27  ;;  %v504_v41 = vsel %vm503_vm15, %v1370_v54, %v500_v26 }
 0x192   :  { %v512_v40 = vmul.f32 %v511_v58, %v486_v61  ;;  %v509_v30 = vsel %vm506_vm1, %v508_v62, %v504_v41 }
 0x194   :  { %v515_v52 = vadd.f32 %v513_v57, %v512_v40  ;;  %v183_v40 = vld [vmem:[%s182_s28] ss:$8 sm:$0x7] }
 0x196   :  { %1371 = vtanh.f32 %v515_v52 }
 0x19c   :  { %v1372_v44 = vpop.eup %1371 }
 0x19d   :  { %v517_v43 = vsub.f32 %v2045_v46, %v1372_v44 }
 0x19f   :  { %v518_v47 = vmul.f32 %v517_v43, %v509_v30 }
 0x1a1   :  { %v2101_v56 = vadd.f32 %v1372_v44, %v518_v47 }
 0x1a3   :  { %520 = vst [vmem:[#allocation3 + $0x1] sm:$0x1] %v2101_v56  ;;  %537 = vmatmul.f32.vlgmr.msrb.gmra.mxu2 %v2101_v56  ;;  %557 = vmatmul.f32.vlgmr.msrb.gmra.mxu3 %v2101_v56 }
 0x1a4   :  { %577 = vmatmul.f32.vlgmr.msra.gmra.mxu0 %v2101_v56  ;;  %789 = vmatpush.msrb.mxu2 %v1792_v12 }
 0x1a5   :  { %863 = vmatpush.msrb.mxu3 %v1753_v0  ;;  %883 = vmatpush.msra.mxu0 %v1755_v1  ;;  %v2452_v0 = vld [vmem:[#allocation32_spill] sm:$0xff]  ;;  %v2453_v1 = vld [vmem:[#allocation26_spill] sm:$0xff] }
 0x1a6   :  { %790 = vmatpush.msrb.mxu2 %v1797_v13 }
 0x1a7   :  { %864 = vmatpush.msrb.mxu3 %v1757_v2  ;;  %884 = vmatpush.msra.mxu0 %v1763_v3  ;;  %v2454_v2 = vld [vmem:[#allocation27_spill] sm:$0xff]  ;;  %v2455_v3 = vld [vmem:[#allocation33_spill] sm:$0xff] }
 0x1a8   :  { %791 = vmatpush.msrb.mxu2 %v1807_v16 }
 0x1a9   :  { %865 = vmatpush.msrb.mxu3 %v1765_v4  ;;  %885 = vmatpush.msra.mxu0 %v1767_v5  ;;  %v2456_v4 = vld [vmem:[#allocation28_spill] sm:$0xff]  ;;  %v2457_v5 = vld [vmem:[#allocation29_spill] sm:$0xff] }
 0x1aa   :  { %792 = vmatpush.msrb.mxu2 %v1817_v20 }
 0x1ab   :  { %866 = vmatpush.msrb.mxu3 %v1772_v6  ;;  %886 = vmatpush.msra.mxu0 %v1774_v7  ;;  %v2458_v6 = vld [vmem:[#allocation34_spill] sm:$0xff] }
 0x1ac   :  { %793 = vmatpush.msrb.mxu2 %v1831_v25  ;;  %v2459_v7 = vld [vmem:[#allocation30_spill] sm:$0xff] }
 0x1ad   :  { %867 = vmatpush.msrb.mxu3 %v1779_v8  ;;  %887 = vmatpush.msra.mxu0 %v1781_v9  ;;  %v2460_v8 = vld [vmem:[#allocation31_spill] sm:$0xff]  ;;  %v169_v9 = vld [vmem:[%s168_s23] ss:$8 sm:$0x7]  ;;  %s238_s23 = scalar_lea.vmem [#allocation8], %s237_s22 }
 0x1ae   :  { %794 = vmatpush.msrb.mxu2 %v1844_v29 }
 0x1af   :  { %868 = vmatpush.msrb.mxu3 %v1788_v10  ;;  %888 = vmatpush.msra.mxu0 %v1790_v11  ;;  %v2461_v10 = vld [vmem:[#allocation24_spill] sm:$0xff] }
 0x1b0   :  { %795 = vmatpush.msrb.mxu2 %v1855_v33  ;;  %v170_v11 = vadd.f32 %v169_v9, %v2461_v10  ;;  %v184_v59 = vadd.f32 %v183_v40, %v2461_v10  ;;  %v2182_v40 = vld [vmem:[#allocation11 + $0x158] sm:$0xff] }
 0x1b1   :  { %869 = vmatpush.msrb.mxu3 %v1799_v14  ;;  %889 = vmatpush.msra.mxu0 %v1801_v15 }
 0x1b2   :  { %796 = vmatpush.msrb.mxu2 %v1867_v36  ;;  %172 = vst.msk [vmem:[#allocation2 + $0x2] ss:$8 sm:$0x7] %vm1837_vm0, %v170_v11 }
 0x1b3   :  { %870 = vmatpush.msrb.mxu3 %v1809_v17  ;;  %890 = vmatpush.msra.mxu0 %v1811_v18  ;;  %186 = vst.msk [vmem:[#allocation2 + $0x3] ss:$8 sm:$0x7] %vm1837_vm0, %v184_v59  ;;  %v2186_v59 = vld [vmem:[#allocation11 + $0x138] sm:$0xff] }
 0x1b4   :  { %797 = vmatpush.msrb.mxu2 %v1877_v39 }
 0x1b5   :  { %871 = vmatpush.msrb.mxu3 %v1819_v21  ;;  %891 = vmatpush.msra.mxu0 %v1821_v22 }
 0x1b6   :  { %798 = vmatpush.msrb.mxu2 %v1887_v42 }
 0x1b7   :  { %872 = vmatpush.msrb.mxu3 %v1827_v23  ;;  %892 = vmatpush.msra.mxu0 %v1829_v24 }
 0x1b8   :  { %799 = vmatpush.msrb.mxu2 %v1897_v45 }
 0x1b9   :  { %873 = vmatpush.msrb.mxu3 %v1847_v31  ;;  %893 = vmatpush.msra.mxu0 %v1849_v32  ;;  %v581_v14 = vld [vmem:[#allocation2 + $0x2] ss:$8 sm:$0x7] }
 0x1ba   :  { %800 = vmatpush.msrb.mxu2 %v1908_v48  ;;  %v603_v15 = vrot.slane %v581_v14, 1  ;;  %v627_v43 = vrot.slane %v581_v14, 2 }
 0x1bb   :  { %874 = vmatpush.msrb.mxu3 %v1859_v34  ;;  %894 = vmatpush.msra.mxu0 %v1861_v35 }
 0x1bc   :  { %801 = vmatpush.msrb.mxu2 %v1913_v50 }
 0x1bd   :  { %875 = vmatpush.msrb.mxu3 %v1869_v37  ;;  %895 = vmatpush.msra.mxu0 %v1871_v38 }
 0x1be   :  { %802 = vmatpush.msrb.mxu2 %v2452_v0 }
 0x1bf   :  { %876 = vmatpush.msrb.mxu3 %v2453_v1  ;;  %896 = vmatpush.msra.mxu0 %v2454_v2 }
 0x1c0   :  { %803 = vmatpush.msrb.mxu2 %v2455_v3 }
 0x1c1   :  { %877 = vmatpush.msrb.mxu3 %v2456_v4  ;;  %897 = vmatpush.msra.mxu0 %v2457_v5 }
 0x1c2   :  { %804 = vmatpush.msrb.mxu2 %v2458_v6 }
 0x1c3   :  { %878 = vmatpush.msrb.mxu3 %v2459_v7  ;;  %898 = vmatpush.msra.mxu0 %v2460_v8 }
 0x221   :  { %v578_v61 = vpop.f32.mrf.mxu0 }
 0x222   :  { %v625_v44 = vadd.f32 %v578_v61, %v2042_v60 }
 0x226   :  { %v538_v17 = vpop.f32.mrf.mxu2  ;;  %v558_v18 = vpop.f32.mrf.mxu3 }
 0x227   :  { %v582_v21 = vadd.f32 %v581_v14, %v538_v17  ;;  %v605_v22 = vadd.f32 %v603_v15, %v558_v18 }
 0x229   :  { %v1327_v23 = vmul.f32 -1.442695, %v582_v21  ;;  %v1328_v24 = vmul.f32 -1.442695, %v605_v22 }
 0x22b   :  { %1373 = vpow2.f32 %v1327_v23 }
 0x22c   :  { %1375 = vpow2.f32 %v1328_v24 }
 0x231   :  { %v1374_v51 = vpop.eup %1373 }
 0x232   :  { %v1376_v46 = vpop.eup %1375  ;;  %v586_v26 = vadd.f32 1.0, %v1374_v51 }
 0x233   :  { %v609_v28 = vadd.f32 1.0, %v1376_v46  ;;  %v2169_v46 = vld [vmem:[#allocation11 + $0x178] sm:$0xff] }
 0x234   :  { %1377 = vrcp.f32 %v586_v26  ;;  %v598_v19 = vand.u32 2147483648, %v586_v26  ;;  %v596_v27 = vand.u32 2147483647, %v586_v26  ;;  %vm592_vm3 = vweird.f32 %v586_v26 }
 0x235   :  { %1379 = vrcp.f32 %v609_v28  ;;  %v621_v15 = vand.u32 2147483648, %v609_v28  ;;  %vm615_vm7 = vweird.f32 %v609_v28  ;;  %v619_v17 = vand.u32 2147483647, %v609_v28 }
 0x236   :  { %v599_v53 = vor.u32 1.1754944e-38, %v598_v19  ;;  %vm597_vm5 = vcmp.eq.f32.partialorder %v596_v27, 8.507059e+37  ;;  %v2217_v19 = vld [vmem:[#allocation11 + $0xe0] sm:$0xff]  ;;  %v2238_v27 = vld [vmem:[#allocation11 + $0x98] sm:$0xff] }
 0x237   :  { %v622_v22 = vor.u32 1.1754944e-38, %v621_v15  ;;  %vm620_vm9 = vcmp.eq.f32.partialorder %v619_v17, 8.507059e+37 }
 0x23a   :  { %v1378_v54 = vpop.eup %1377 }
 0x23b   :  { %v1380_v55 = vpop.eup %1379  ;;  %v588_v63 = vmul.f32 %v1378_v54, %v586_v26  ;;  %vm593_vm2 = vweird.f32 %v1378_v54  ;;  %v2172_v26 = vld [vmem:[#allocation11 + $0x168] sm:$0xff] }
 0x23c   :  { %v611_v57 = vmul.f32 %v1380_v55, %v609_v28  ;;  %vm594_vm4 = vmor %vm592_vm3, %vm593_vm2  ;;  %vm616_vm6 = vweird.f32 %v1380_v55  ;;  %v2179_v28 = vld [vmem:[#allocation11 + $0x150] sm:$0xff] }
 0x23d   :  { %v589_v49 = vsub.f32 1.0, %v588_v63  ;;  %vm617_vm8 = vmor %vm615_vm7, %vm616_vm6  ;;  %v2203_v63 = vld [vmem:[#allocation11 + $0x110] sm:$0xff] }
 0x23e   :  { %v612_v41 = vsub.f32 1.0, %v611_v57  ;;  %v2224_v57 = vld [vmem:[#allocation11 + $0xc8] sm:$0xff] }
 0x23f   :  { %v590_v58 = vmul.f32 %v1378_v54, %v589_v49  ;;  %v2210_v49 = vld [vmem:[#allocation11 + $0xf8] sm:$0xff] }
 0x240   :  { %v613_v9 = vmul.f32 %v1380_v55, %v612_v41 }
 0x241   :  { %v591_v52 = vadd.f32 %v1378_v54, %v590_v58  ;;  %v2231_v58 = vld [vmem:[#allocation11 + $0xb0] sm:$0xff] }
 0x242   :  { %v614_v11 = vadd.f32 %v1380_v55, %v613_v9 }
 0x243   :  { %v595_v62 = vsel %vm594_vm4, %v1378_v54, %v591_v52  ;;  %v2189_v54 = vld [vmem:[#allocation11 + $0x140] sm:$0xff] }
 0x244   :  { %v600_v30 = vsel %vm597_vm5, %v599_v53, %v595_v62  ;;  %v618_v18 = vsel %vm617_vm8, %v1380_v55, %v614_v11  ;;  %v2196_v55 = vld [vmem:[#allocation11 + $0x128] sm:$0xff] }
 0x245   :  { %v626_v47 = vmul.f32 %v625_v44, %v600_v30  ;;  %v623_v24 = vsel %vm620_vm9, %v622_v22, %v618_v18 }
 0x247   :  { %v629_v10 = vadd.f32 %v627_v43, %v626_v47 }
 0x249   :  { %1381 = vtanh.f32 %v629_v10 }
 0x24f   :  { %v1382_v21 = vpop.eup %1381 }
 0x250   :  { %v631_v23 = vsub.f32 %v2101_v56, %v1382_v21  ;;  %v2175_v56 = vld [vmem:[#allocation11 + $0x170] sm:$0xff] }
 0x252   :  { %v632_v51 = vmul.f32 %v631_v23, %v623_v24 }
 0x254   :  { %v2163_v14 = vadd.f32 %v1382_v21, %v632_v51 }
 0x256   :  { %634 = vst [vmem:[#allocation3 + $0x2] sm:$0x1] %v2163_v14  ;;  %651 = vmatmul.f32.vlgmr.msra.gmra.mxu1 %v2163_v14  ;;  %671 = vmatmul.f32.vlgmr.msra.gmra.mxu2 %v2163_v14 }
 0x257   :  { %691 = vmatmul.f32.vlgmr.msra.gmra.mxu3 %v2163_v14  ;;  %903 = vmatpush.msra.mxu1 %v2169_v46 }
 0x258   :  { %977 = vmatpush.msra.mxu2 %v2172_v26  ;;  %997 = vmatpush.msra.mxu3 %v2175_v56 }
 0x259   :  { %904 = vmatpush.msra.mxu1 %v1797_v13  ;;  %v2193_v13 = vld [vmem:[#allocation11 + $0x120] sm:$0xff] }
 0x25a   :  { %978 = vmatpush.msra.mxu2 %v2179_v28  ;;  %998 = vmatpush.msra.mxu3 %v2182_v40 }
 0x25b   :  { %905 = vmatpush.msra.mxu1 %v1807_v16  ;;  %v2200_v16 = vld [vmem:[#allocation11 + $0x108] sm:$0xff] }
 0x25c   :  { %979 = vmatpush.msra.mxu2 %v2186_v59  ;;  %999 = vmatpush.msra.mxu3 %v2189_v54 }
 0x25d   :  { %906 = vmatpush.msra.mxu1 %v1817_v20  ;;  %v2207_v20 = vld [vmem:[#allocation11 + $0xf0] sm:$0xff] }
 0x25e   :  { %980 = vmatpush.msra.mxu2 %v2193_v13  ;;  %1000 = vmatpush.msra.mxu3 %v2196_v55 }
 0x25f   :  { %907 = vmatpush.msra.mxu1 %v1831_v25  ;;  %v2214_v25 = vld [vmem:[#allocation11 + $0xd8] sm:$0xff] }
 0x260   :  { %981 = vmatpush.msra.mxu2 %v2200_v16  ;;  %1001 = vmatpush.msra.mxu3 %v2203_v63 }
 0x261   :  { %908 = vmatpush.msra.mxu1 %v1844_v29  ;;  %v2221_v29 = vld [vmem:[#allocation11 + $0xc0] sm:$0xff] }
 0x262   :  { %982 = vmatpush.msra.mxu2 %v2207_v20  ;;  %1002 = vmatpush.msra.mxu3 %v2210_v49 }
 0x263   :  { %909 = vmatpush.msra.mxu1 %v1855_v33  ;;  %v2228_v33 = vld [vmem:[#allocation11 + $0xa8] sm:$0xff] }
 0x264   :  { %983 = vmatpush.msra.mxu2 %v2214_v25  ;;  %1003 = vmatpush.msra.mxu3 %v2217_v19 }
 0x265   :  { %910 = vmatpush.msra.mxu1 %v1867_v36  ;;  %v2235_v36 = vld [vmem:[#allocation11 + $0x90] sm:$0xff] }
 0x266   :  { %984 = vmatpush.msra.mxu2 %v2221_v29  ;;  %1004 = vmatpush.msra.mxu3 %v2224_v57 }
 0x267   :  { %911 = vmatpush.msra.mxu1 %v1877_v39 }
 0x268   :  { %985 = vmatpush.msra.mxu2 %v2228_v33  ;;  %1005 = vmatpush.msra.mxu3 %v2231_v58 }
 0x269   :  { %912 = vmatpush.msra.mxu1 %v1887_v42 }
 0x26a   :  { %986 = vmatpush.msra.mxu2 %v2235_v36  ;;  %1006 = vmatpush.msra.mxu3 %v2238_v27 }
 0x26b   :  { %913 = vmatpush.msra.mxu1 %v1897_v45 }
 0x26c   :  { %987 = vmatpush.msra.mxu2 %v1847_v31  ;;  %1007 = vmatpush.msra.mxu3 %v1849_v32  ;;  %v695_v31 = vld [vmem:[#allocation2 + $0x3] ss:$8 sm:$0x7] }
 0x26d   :  { %914 = vmatpush.msra.mxu1 %v1908_v48  ;;  %v741_v62 = vrot.slane %v695_v31, 2 }
 0x26e   :  { %988 = vmatpush.msra.mxu2 %v1859_v34  ;;  %1008 = vmatpush.msra.mxu3 %v1861_v35 }
 0x26f   :  { %915 = vmatpush.msra.mxu1 %v1913_v50 }
 0x270   :  { %989 = vmatpush.msra.mxu2 %v1869_v37  ;;  %1009 = vmatpush.msra.mxu3 %v1871_v38  ;;  %v717_v37 = vrot.slane %v695_v31, 1 }
 0x271   :  { %916 = vmatpush.msra.mxu1 %v2452_v0  ;;  %v197_v0 = vld [vmem:[%s196_s10] ss:$8 sm:$0x7] }
 0x272   :  { %990 = vmatpush.msra.mxu2 %v2453_v1  ;;  %1010 = vmatpush.msra.mxu3 %v2454_v2  ;;  %v2259_v2 = vld [vmem:[#allocation9] sm:$0x7] }
 0x273   :  { %917 = vmatpush.msra.mxu1 %v2455_v3  ;;  %v198_v3 = vadd.f32 %v2259_v2, %v197_v0 }
 0x274   :  { %991 = vmatpush.msra.mxu2 %v2456_v4  ;;  %1011 = vmatpush.msra.mxu3 %v2457_v5 }
 0x275   :  { %918 = vmatpush.msra.mxu1 %v2458_v6  ;;  %200 = vst.msk [vmem:[#allocation2 + $0x4] ss:$8 sm:$0x7] %vm1837_vm0, %v198_v3 }
 0x276   :  { %992 = vmatpush.msra.mxu2 %v2459_v7  ;;  %1012 = vmatpush.msra.mxu3 %v2460_v8 }
 0x2d3   :  { %v652_v32 = vpop.f32.mrf.mxu1 }
 0x2d4   :  { %v696_v34 = vadd.f32 %v695_v31, %v652_v32 }
 0x2d6   :  { %v1329_v35 = vmul.f32 -1.442695, %v696_v34 }
 0x2d8   :  { %1383 = vpow2.f32 %v1329_v35 }
 0x2d9   :  { %v672_v38 = vpop.f32.mrf.mxu2 }
 0x2da   :  { %v719_v39 = vadd.f32 %v717_v37, %v672_v38  ;;  %v692_v53 = vpop.f32.mrf.mxu3  ;;  %v2275_v37 = vld [vmem:[#allocation11 + $0x160] sm:$0xff]  ;;  %v2285_v38 = vld [vmem:[#allocation11 + $0x130] sm:$0xff] }
 0x2db   :  { %v739_v9 = vadd.f32 %v692_v53, %v2042_v60 }
 0x2dc   :  { %v1330_v42 = vmul.f32 -1.442695, %v719_v39  ;;  %v1482_v39 = vld [vmem:[#allocation11 + $0x20] sm:$0xff] }
 0x2de   :  { %v1384_v45 = vpop.eup %1383  ;;  %1385 = vpow2.f32 %v1330_v42  ;;  %v2335_v42 = vld [vmem:[#allocation11 + $0x10] sm:$0xff] }
 0x2df   :  { %v700_v48 = vadd.f32 1.0, %v1384_v45  ;;  %v1484_v45 = vld [vmem:[#allocation11] sm:$0xff] }
 0x2e1   :  { %1387 = vrcp.f32 %v700_v48  ;;  %v712_v7 = vand.u32 2147483648, %v700_v48  ;;  %v710_v61 = vand.u32 2147483647, %v700_v48  ;;  %vm706_vm11 = vweird.f32 %v700_v48 }
 0x2e3   :  { %v713_v43 = vor.u32 1.1754944e-38, %v712_v7  ;;  %vm711_vm13 = vcmp.eq.f32.partialorder %v710_v61, 8.507059e+37 }
 0x2e4   :  { %v1386_v50 = vpop.eup %1385 }
 0x2e5   :  { %v723_v1 = vadd.f32 1.0, %v1386_v50  ;;  %v809_v50 = vld [vmem:[#allocation2 + $0x4] ss:$8 sm:$0x7] }
 0x2e6   :  { %v831_v0 = vrot.slane %v809_v50, 1 }
 0x2e7   :  { %v1388_v4 = vpop.eup %1387  ;;  %1389 = vrcp.f32 %v723_v1  ;;  %v735_v21 = vand.u32 2147483648, %v723_v1  ;;  %vm729_vm15 = vweird.f32 %v723_v1  ;;  %v733_v22 = vand.u32 2147483647, %v723_v1 }
 0x2e8   :  { %v702_v5 = vmul.f32 %v1388_v4, %v700_v48  ;;  %vm707_vm10 = vweird.f32 %v1388_v4  ;;  %v1485_v48 = vld [vmem:[#allocation11 + $0x8] sm:$0xff] }
 0x2e9   :  { %vm708_vm12 = vmor %vm706_vm11, %vm707_vm10  ;;  %v736_v51 = vor.u32 1.1754944e-38, %v735_v21  ;;  %vm734_vm2 = vcmp.eq.f32.partialorder %v733_v22, 8.507059e+37 }
 0x2ea   :  { %v703_v6 = vsub.f32 1.0, %v702_v5 }
 0x2ec   :  { %v704_v8 = vmul.f32 %v1388_v4, %v703_v6 }
 0x2ed   :  { %v1390_v52 = vpop.eup %1389 }
 0x2ee   :  { %v725_v41 = vmul.f32 %v1390_v52, %v723_v1  ;;  %v705_v44 = vadd.f32 %v1388_v4, %v704_v8  ;;  %vm730_vm14 = vweird.f32 %v1390_v52 }
 0x2ef   :  { %vm731_vm1 = vmor %vm729_vm15, %vm730_vm14 }
 0x2f0   :  { %v726_v30 = vsub.f32 1.0, %v725_v41  ;;  %v709_v47 = vsel %vm708_vm12, %v1388_v4, %v705_v44  ;;  %v211_v41 = vld [vmem:[%s210_s2] ss:$8 sm:$0x7] }
 0x2f1   :  { %v714_v10 = vsel %vm711_vm13, %v713_v43, %v709_v47  ;;  %v212_v44 = vadd.f32 %v2259_v2, %v211_v41 }
 0x2f2   :  { %v740_v11 = vmul.f32 %v739_v9, %v714_v10  ;;  %v727_v15 = vmul.f32 %v1390_v52, %v726_v30 }
 0x2f3   :  { %214 = vst.msk [vmem:[#allocation2 + $0x5] ss:$8 sm:$0x7] %vm1837_vm0, %v212_v44 }
 0x2f4   :  { %v743_v17 = vadd.f32 %v741_v62, %v740_v11  ;;  %v728_v18 = vadd.f32 %v1390_v52, %v727_v15 }
 0x2f6   :  { %1391 = vtanh.f32 %v743_v17  ;;  %v732_v23 = vsel %vm731_vm1, %v1390_v52, %v728_v18 }
 0x2f7   :  { %v737_v32 = vsel %vm734_vm2, %v736_v51, %v732_v23  ;;  %v855_v23 = vrot.slane %v809_v50, 2 }
 0x2fc   :  { %v1392_v24 = vpop.eup %1391 }
 0x2fd   :  { %v745_v31 = vsub.f32 %v2163_v14, %v1392_v24  ;;  %v2280_v14 = vld [vmem:[#allocation11 + $0x148] sm:$0xff] }
 0x2ff   :  { %v746_v34 = vmul.f32 %v745_v31, %v737_v32 }
 0x301   :  { %v2266_v35 = vadd.f32 %v1392_v24, %v746_v34 }
 0x303   :  { %748 = vst [vmem:[#allocation3 + $0x3] sm:$0x1] %v2266_v35  ;;  %765 = vmatmul.f32.vlgmr.msrb.gmra.mxu0 %v2266_v35  ;;  %785 = vmatmul.f32.vlgmr.msrb.gmra.mxu1 %v2266_v35 }
 0x304   :  { %805 = vmatmul.f32.vlgmr.msrb.gmra.mxu2 %v2266_v35  ;;  %1017 = vmatpush.msrb.mxu0 %v2169_v46 }
 0x305   :  { %1091 = vmatpush.msrb.mxu1 %v2172_v26  ;;  %1111 = vmatpush.msrb.mxu2 %v2175_v56  ;;  %v2290_v26 = vld [vmem:[#allocation11 + $0x118] sm:$0xff]  ;;  %v2295_v56 = vld [vmem:[#allocation11 + $0x100] sm:$0xff] }
 0x306   :  { %1018 = vmatpush.msrb.mxu0 %v2275_v37 }
 0x307   :  { %1092 = vmatpush.msrb.mxu1 %v2179_v28  ;;  %1112 = vmatpush.msrb.mxu2 %v2182_v40  ;;  %v2300_v28 = vld [vmem:[#allocation11 + $0xe8] sm:$0xff]  ;;  %v2305_v40 = vld [vmem:[#allocation11 + $0xd0] sm:$0xff] }
 0x308   :  { %1019 = vmatpush.msrb.mxu0 %v2280_v14 }
 0x309   :  { %1093 = vmatpush.msrb.mxu1 %v2186_v59  ;;  %1113 = vmatpush.msrb.mxu2 %v2189_v54  ;;  %v2310_v59 = vld [vmem:[#allocation11 + $0xb8] sm:$0xff]  ;;  %v2315_v54 = vld [vmem:[#allocation11 + $0xa0] sm:$0xff] }
 0x30a   :  { %1020 = vmatpush.msrb.mxu0 %v2285_v38 }
 0x30b   :  { %1094 = vmatpush.msrb.mxu1 %v2193_v13  ;;  %1114 = vmatpush.msrb.mxu2 %v2196_v55  ;;  %v2320_v13 = vld [vmem:[#allocation11 + $0x88] sm:$0xff]  ;;  %v1469_v55 = vld [vmem:[#allocation11 + $0x78] sm:$0xff] }
 0x30c   :  { %1021 = vmatpush.msrb.mxu0 %v2290_v26 }
 0x30d   :  { %1095 = vmatpush.msrb.mxu1 %v2200_v16  ;;  %1115 = vmatpush.msrb.mxu2 %v2203_v63  ;;  %v1470_v16 = vld [vmem:[#allocation11 + $0x80] sm:$0xff]  ;;  %v2323_v63 = vld [vmem:[#allocation11 + $0x70] sm:$0xff] }
 0x30e   :  { %1022 = vmatpush.msrb.mxu0 %v2295_v56 }
 0x30f   :  { %1096 = vmatpush.msrb.mxu1 %v2207_v20  ;;  %1116 = vmatpush.msrb.mxu2 %v2210_v49  ;;  %v1472_v20 = vld [vmem:[#allocation11 + $0x60] sm:$0xff]  ;;  %v1473_v49 = vld [vmem:[#allocation11 + $0x68] sm:$0xff] }
 0x310   :  { %1023 = vmatpush.msrb.mxu0 %v2300_v28 }
 0x311   :  { %1097 = vmatpush.msrb.mxu1 %v2214_v25  ;;  %1117 = vmatpush.msrb.mxu2 %v2217_v19  ;;  %v2326_v25 = vld [vmem:[#allocation11 + $0x58] sm:$0xff]  ;;  %v1475_v19 = vld [vmem:[#allocation11 + $0x48] sm:$0xff] }
 0x312   :  { %1024 = vmatpush.msrb.mxu0 %v2305_v40 }
 0x313   :  { %1098 = vmatpush.msrb.mxu1 %v2221_v29  ;;  %1118 = vmatpush.msrb.mxu2 %v2224_v57  ;;  %v1476_v29 = vld [vmem:[#allocation11 + $0x50] sm:$0xff]  ;;  %v2329_v57 = vld [vmem:[#allocation11 + $0x40] sm:$0xff] }
 0x314   :  { %1025 = vmatpush.msrb.mxu0 %v2310_v59 }
 0x315   :  { %1099 = vmatpush.msrb.mxu1 %v2228_v33  ;;  %1119 = vmatpush.msrb.mxu2 %v2231_v58  ;;  %v1478_v33 = vld [vmem:[#allocation11 + $0x30] sm:$0xff]  ;;  %v1479_v58 = vld [vmem:[#allocation11 + $0x38] sm:$0xff] }
 0x316   :  { %1026 = vmatpush.msrb.mxu0 %v2315_v54 }
 0x317   :  { %1100 = vmatpush.msrb.mxu1 %v2235_v36  ;;  %1120 = vmatpush.msrb.mxu2 %v2238_v27  ;;  %v2332_v36 = vld [vmem:[#allocation11 + $0x28] sm:$0xff]  ;;  %v1481_v27 = vld [vmem:[#allocation11 + $0x18] sm:$0xff] }
 0x318   :  { %1027 = vmatpush.msrb.mxu0 %v2320_v13 }
 0x319   :  { %1101 = vmatpush.msrb.mxu1 %v1469_v55  ;;  %1121 = vmatpush.msrb.mxu2 %v1470_v16 }
 0x31a   :  { %1028 = vmatpush.msrb.mxu0 %v2323_v63 }
 0x31b   :  { %1102 = vmatpush.msrb.mxu1 %v1472_v20  ;;  %1122 = vmatpush.msrb.mxu2 %v1473_v49 }
 0x31c   :  { %1029 = vmatpush.msrb.mxu0 %v2326_v25 }
 0x31d   :  { %1103 = vmatpush.msrb.mxu1 %v1475_v19  ;;  %1123 = vmatpush.msrb.mxu2 %v1476_v29 }
 0x31e   :  { %1030 = vmatpush.msrb.mxu0 %v2329_v57 }
 0x31f   :  { %1104 = vmatpush.msrb.mxu1 %v1478_v33  ;;  %1124 = vmatpush.msrb.mxu2 %v1479_v58 }
 0x320   :  { %1031 = vmatpush.msrb.mxu0 %v2332_v36 }
 0x321   :  { %1105 = vmatpush.msrb.mxu1 %v1481_v27  ;;  %1125 = vmatpush.msrb.mxu2 %v1482_v39 }
 0x322   :  { %1032 = vmatpush.msrb.mxu0 %v2335_v42 }
 0x323   :  { %1106 = vmatpush.msrb.mxu1 %v1484_v45  ;;  %1126 = vmatpush.msrb.mxu2 %v1485_v48 }
 0x380   :  { %v766_v1 = vpop.f32.mrf.mxu0  ;;  %v786_v3 = vpop.f32.mrf.mxu1 }
 0x381   :  { %v810_v4 = vadd.f32 %v809_v50, %v766_v1  ;;  %v833_v5 = vadd.f32 %v831_v0, %v786_v3 }
 0x383   :  { %v1331_v6 = vmul.f32 -1.442695, %v810_v4  ;;  %v1332_v7 = vmul.f32 -1.442695, %v833_v5 }
 0x385   :  { %1393 = vpow2.f32 %v1331_v6  ;;  %v2365_v6 = vld [vmem:[#allocation12] sm:$0x1] }
 0x386   :  { %1395 = vpow2.f32 %v1332_v7 }
 0x387   :  { %v806_v17 = vpop.f32.mrf.mxu2 }
 0x388   :  { %v853_v51 = vadd.f32 %v806_v17, %v2042_v60 }
 0x38b   :  { %v1394_v8 = vpop.eup %1393 }
 0x38c   :  { %v1396_v61 = vpop.eup %1395  ;;  %v814_v52 = vadd.f32 1.0, %v1394_v8 }
 0x38d   :  { %v837_v53 = vadd.f32 1.0, %v1396_v61 }
 0x38e   :  { %1397 = vrcp.f32 %v814_v52  ;;  %v826_v10 = vand.u32 2147483648, %v814_v52  ;;  %v824_v15 = vand.u32 2147483647, %v814_v52  ;;  %vm820_vm4 = vweird.f32 %v814_v52 }
 0x38f   :  { %1399 = vrcp.f32 %v837_v53  ;;  %v849_v20 = vand.u32 2147483648, %v837_v53  ;;  %vm843_vm8 = vweird.f32 %v837_v53  ;;  %v847_v49 = vand.u32 2147483647, %v837_v53 }
 0x390   :  { %v827_v22 = vor.u32 1.1754944e-38, %v826_v10  ;;  %vm825_vm6 = vcmp.eq.f32.partialorder %v824_v15, 8.507059e+37 }
 0x391   :  { %v850_v33 = vor.u32 1.1754944e-38, %v849_v20  ;;  %vm848_vm10 = vcmp.eq.f32.partialorder %v847_v49, 8.507059e+37 }
 0x394   :  { %v1398_v62 = vpop.eup %1397 }
 0x395   :  { %v1400_v43 = vpop.eup %1399  ;;  %v816_v30 = vmul.f32 %v1398_v62, %v814_v52  ;;  %vm821_vm3 = vweird.f32 %v1398_v62 }
 0x396   :  { %v839_v9 = vmul.f32 %v1400_v43, %v837_v53  ;;  %vm822_vm5 = vmor %vm820_vm4, %vm821_vm3  ;;  %vm844_vm7 = vweird.f32 %v1400_v43 }
 0x397   :  { %v817_v47 = vsub.f32 1.0, %v816_v30  ;;  %vm845_vm9 = vmor %vm843_vm8, %vm844_vm7 }
 0x398   :  { %v840_v21 = vsub.f32 1.0, %v839_v9 }
 0x399   :  { %v818_v11 = vmul.f32 %v1398_v62, %v817_v47 }
 0x39a   :  { %v841_v34 = vmul.f32 %v1400_v43, %v840_v21 }
 0x39b   :  { %v819_v18 = vadd.f32 %v1398_v62, %v818_v11 }
 0x39c   :  { %v842_v16 = vadd.f32 %v1400_v43, %v841_v34 }
 0x39d   :  { %v823_v24 = vsel %vm822_vm5, %v1398_v62, %v819_v18  ;;  %v225_v18 = vld [vmem:[%s224_s18] ss:$8 sm:$0x7] }
 0x39e   :  { %v828_v31 = vsel %vm825_vm6, %v827_v22, %v823_v24  ;;  %v846_v19 = vsel %vm845_vm9, %v1400_v43, %v842_v16  ;;  %v226_v21 = vadd.f32 %v2259_v2, %v225_v18  ;;  %v1212_v18 = vld [vmem:[#allocation14 + $0x30] sm:$0xff] }
 0x39f   :  { %v854_v32 = vmul.f32 %v853_v51, %v828_v31  ;;  %v851_v27 = vsel %vm848_vm10, %v850_v33, %v846_v19 }
 0x3a0   :  { %228 = vst.msk [vmem:[#allocation2 + $0x6] ss:$8 sm:$0x7] %vm1837_vm0, %v226_v21 }
 0x3a1   :  { %v857_v55 = vadd.f32 %v855_v23, %v854_v32 }
 0x3a3   :  { %1401 = vtanh.f32 %v857_v55 }
 0x3a7   :  { %v1037_v22 = vld [vmem:[#allocation2 + $0x6] ss:$8 sm:$0x7] }
 0x3a8   :  { %v1059_v23 = vrot.slane %v1037_v22, 1  ;;  %v1083_v12 = vrot.slane %v1037_v22, 2 }
 0x3a9   :  { %v1402_v29 = vpop.eup %1401 }
 0x3aa   :  { %v859_v58 = vsub.f32 %v2266_v35, %v1402_v29 }
 0x3ac   :  { %v860_v39 = vmul.f32 %v859_v58, %v851_v27 }
 0x3ae   :  { %v2343_v60 = vadd.f32 %v1402_v29, %v860_v39  ;;  %v239_v29 = vld [vmem:[%s238_s23] ss:$8 sm:$0x7] }
 0x3af   :  { %v240_v33 = vadd.f32 %v2259_v2, %v239_v29 }
 0x3b0   :  { %862 = vst [vmem:[#allocation3 + $0x4] sm:$0x1] %v2343_v60  ;;  %879 = vmatmul.f32.vlgmr.msrb.gmra.mxu3 %v2343_v60  ;;  %899 = vmatmul.f32.vlgmr.msra.gmra.mxu0 %v2343_v60 }
 0x3b1   :  { %919 = vmatmul.f32.vlgmr.msra.gmra.mxu1 %v2343_v60  ;;  %1131 = vmatpush.msrb.mxu3 %v2169_v46  ;;  %v923_v46 = vld [vmem:[#allocation2 + $0x5] ss:$8 sm:$0x7]  ;;  %242 = vst.msk [vmem:[#allocation2 + $0x7] ss:$8 sm:$0x7] %vm1837_vm0, %v240_v33 }
 0x3b2   :  { %v945_v35 = vrot.slane %v923_v46, 1  ;;  %v969_v5 = vrot.slane %v923_v46, 2 }
 0x3b3   :  { %1132 = vmatpush.msrb.mxu3 %v2275_v37 }
 0x3b5   :  { %1133 = vmatpush.msrb.mxu3 %v2280_v14 }
 0x3b7   :  { %1134 = vmatpush.msrb.mxu3 %v2285_v38 }
 0x3b9   :  { %1135 = vmatpush.msrb.mxu3 %v2290_v26 }
 0x3bb   :  { %1136 = vmatpush.msrb.mxu3 %v2295_v56 }
 0x3bd   :  { %1137 = vmatpush.msrb.mxu3 %v2300_v28 }
 0x3bf   :  { %1138 = vmatpush.msrb.mxu3 %v2305_v40 }
 0x3c1   :  { %1139 = vmatpush.msrb.mxu3 %v2310_v59 }
 0x3c3   :  { %1140 = vmatpush.msrb.mxu3 %v2315_v54 }
 0x3c5   :  { %1141 = vmatpush.msrb.mxu3 %v2320_v13 }
 0x3c7   :  { %1142 = vmatpush.msrb.mxu3 %v2323_v63 }
 0x3c9   :  { %1143 = vmatpush.msrb.mxu3 %v2326_v25 }
 0x3cb   :  { %1144 = vmatpush.msrb.mxu3 %v2329_v57 }
 0x3cd   :  { %1145 = vmatpush.msrb.mxu3 %v2332_v36 }
 0x3cf   :  { %1146 = vmatpush.msrb.mxu3 %v2335_v42 }
 0x42d   :  { %v900_v37 = vpop.f32.mrf.mxu0 }
 0x42e   :  { %v947_v14 = vadd.f32 %v945_v35, %v900_v37  ;;  %v920_v0 = vpop.f32.mrf.mxu1 }
 0x42f   :  { %v967_v7 = vadd.f32 %v2365_v6, %v920_v0 }
 0x430   :  { %v1334_v38 = vmul.f32 -1.442695, %v947_v14 }
 0x432   :  { %1403 = vpow2.f32 %v1334_v38 }
 0x433   :  { %v880_v26 = vpop.f32.mrf.mxu3 }
 0x434   :  { %v924_v56 = vadd.f32 %v923_v46, %v880_v26 }
 0x436   :  { %v1333_v28 = vmul.f32 -1.442695, %v924_v56 }
 0x438   :  { %1405 = vpow2.f32 %v1333_v28  ;;  %v1404_v40 = vpop.eup %1403 }
 0x439   :  { %v951_v54 = vadd.f32 1.0, %v1404_v40 }
 0x43b   :  { %v963_v62 = vand.u32 2147483648, %v951_v54  ;;  %vm957_vm1 = vweird.f32 %v951_v54  ;;  %v961_v43 = vand.u32 2147483647, %v951_v54 }
 0x43d   :  { %v964_v9 = vor.u32 1.1754944e-38, %v963_v62  ;;  %vm962_vm3 = vcmp.eq.f32.partialorder %v961_v43, 8.507059e+37  ;;  %v1216_v43 = vld [vmem:[#allocation14 + $0x50] sm:$0xff] }
 0x43e   :  { %v1406_v59 = vpop.eup %1405 }
 0x43f   :  { %v928_v13 = vadd.f32 1.0, %v1406_v59 }
 0x441   :  { %1407 = vrcp.f32 %v928_v13  ;;  %v940_v45 = vand.u32 2147483648, %v928_v13  ;;  %v938_v50 = vand.u32 2147483647, %v928_v13  ;;  %vm934_vm12 = vweird.f32 %v928_v13 }
 0x442   :  { %1409 = vrcp.f32 %v951_v54 }
 0x443   :  { %v941_v4 = vor.u32 1.1754944e-38, %v940_v45  ;;  %vm939_vm14 = vcmp.eq.f32.partialorder %v938_v50, 8.507059e+37 }
 0x447   :  { %v1408_v63 = vpop.eup %1407 }
 0x448   :  { %v1410_v25 = vpop.eup %1409  ;;  %v930_v57 = vmul.f32 %v1408_v63, %v928_v13  ;;  %vm935_vm11 = vweird.f32 %v1408_v63 }
 0x449   :  { %v953_v42 = vmul.f32 %v1410_v25, %v951_v54  ;;  %vm936_vm13 = vmor %vm934_vm12, %vm935_vm11  ;;  %vm958_vm15 = vweird.f32 %v1410_v25 }
 0x44a   :  { %v931_v36 = vsub.f32 1.0, %v930_v57  ;;  %vm959_vm2 = vmor %vm957_vm1, %vm958_vm15 }
 0x44b   :  { %v954_v3 = vsub.f32 1.0, %v953_v42 }
 0x44c   :  { %v932_v48 = vmul.f32 %v1408_v63, %v931_v36 }
 0x44d   :  { %v955_v53 = vmul.f32 %v1410_v25, %v954_v3 }
 0x44e   :  { %v933_v1 = vadd.f32 %v1408_v63, %v932_v48 }
 0x44f   :  { %v956_v44 = vadd.f32 %v1410_v25, %v955_v53 }
 0x450   :  { %v937_v8 = vsel %vm936_vm13, %v1408_v63, %v933_v1 }
 0x451   :  { %v942_v61 = vsel %vm939_vm14, %v941_v4, %v937_v8  ;;  %v960_v30 = vsel %vm959_vm2, %v1410_v25, %v956_v44  ;;  %v1221_v4 = vld [vmem:[#allocation14 + $0x78] sm:$0xff] }
 0x452   :  { %v968_v52 = vmul.f32 %v967_v7, %v942_v61  ;;  %v965_v11 = vsel %vm962_vm3, %v964_v9, %v960_v30  ;;  %1226 = vmatpush.msra.mxu0 %v1221_v4  ;;  %v1219_v7 = vld [vmem:[#allocation14 + $0x68] sm:$0xff]  ;;  %v2389_v8 = vld [vmem:[#allocation2 + $0x7] ss:$8 sm:$0x7] }
 0x453   :  { %v1218_v61 = vld [vmem:[#allocation14 + $0x60] sm:$0xff]  ;;  %v1173_v62 = vrot.slane %v2389_v8, 1  ;;  %v1215_v30 = vld [vmem:[#allocation14 + $0x48] sm:$0xff] }
 0x454   :  { %v971_v41 = vadd.f32 %v969_v5, %v968_v52  ;;  %v1220_v5 = vld [vmem:[#allocation14 + $0x70] sm:$0xff] }
 0x455   :  { %1227 = vmatpush.msra.mxu0 %v1220_v5 }
 0x456   :  { %1411 = vtanh.f32 %v971_v41  ;;  %v1217_v41 = vld [vmem:[#allocation14 + $0x58] sm:$0xff] }
 0x457   :  { %1228 = vmatpush.msra.mxu0 %v1219_v7 }
 0x459   :  { %1229 = vmatpush.msra.mxu0 %v1218_v61 }
 0x45b   :  { %1230 = vmatpush.msra.mxu0 %v1217_v41 }
 0x45c   :  { %v1412_v47 = vpop.eup %1411 }
 0x45d   :  { %v973_v10 = vsub.f32 %v2343_v60, %v1412_v47  ;;  %1231 = vmatpush.msra.mxu0 %v1216_v43 }
 0x45f   :  { %v974_v15 = vmul.f32 %v973_v10, %v965_v11  ;;  %1232 = vmatpush.msra.mxu0 %v1215_v30  ;;  %v1214_v10 = vld [vmem:[#allocation14 + $0x40] sm:$0xff] }
 0x461   :  { %v2369_v17 = vadd.f32 %v1412_v47, %v974_v15  ;;  %1233 = vmatpush.msra.mxu0 %v1214_v10  ;;  %v1213_v15 = vld [vmem:[#allocation14 + $0x38] sm:$0xff] }
 0x463   :  { %976 = vst [vmem:[#allocation3 + $0x5] sm:$0x1] %v2369_v17  ;;  %993 = vmatmul.f32.vlgmr.msra.gmra.mxu2 %v2369_v17  ;;  %1013 = vmatmul.f32.vlgmr.msra.gmra.mxu3 %v2369_v17 }
 0x464   :  { %1033 = vmatmul.f32.vlgmr.msrb.gmra.mxu0 %v2369_v17 }
 0x465   :  { %1234 = vmatpush.msra.mxu0 %v1213_v15 }
 0x467   :  { %1235 = vmatpush.msra.mxu0 %v1212_v18 }
 0x4e1   :  { %v1034_v38 = vpop.f32.mrf.mxu0 }
 0x4e2   :  { %v1081_v2 = vadd.f32 %v2365_v6, %v1034_v38 }
 0x4e6   :  { %v994_v24 = vpop.f32.mrf.mxu2  ;;  %v1014_v51 = vpop.f32.mrf.mxu3 }
 0x4e7   :  { %v1038_v31 = vadd.f32 %v1037_v22, %v994_v24  ;;  %v1061_v32 = vadd.f32 %v1059_v23, %v1014_v51  ;;  %v1211_v22 = vld [vmem:[#allocation14 + $0x28] sm:$0xff]  ;;  %v1210_v23 = vld [vmem:[#allocation14 + $0x20] sm:$0xff]  ;;  %v1209_v24 = vld [vmem:[#allocation14 + $0x18] sm:$0xff] }
 0x4e8   :  { %1236 = vmatpush.msra.mxu0 %v1211_v22 }
 0x4e9   :  { %v1335_v34 = vmul.f32 -1.442695, %v1038_v31  ;;  %v1336_v55 = vmul.f32 -1.442695, %v1061_v32  ;;  %v1208_v31 = vld [vmem:[#allocation14 + $0x10] sm:$0xff] }
 0x4ea   :  { %1237 = vmatpush.msra.mxu0 %v1210_v23 }
 0x4eb   :  { %1413 = vpow2.f32 %v1335_v34  ;;  %v1207_v34 = vld [vmem:[#allocation14 + $0x8] sm:$0xff] }
 0x4ec   :  { %1415 = vpow2.f32 %v1336_v55  ;;  %1238 = vmatpush.msra.mxu0 %v1209_v24 }
 0x4ee   :  { %1239 = vmatpush.msra.mxu0 %v1208_v31 }
 0x4f0   :  { %1240 = vmatpush.msra.mxu0 %v1207_v34 }
 0x4f1   :  { %v1414_v16 = vpop.eup %1413 }
 0x4f2   :  { %v1416_v20 = vpop.eup %1415  ;;  %v1042_v49 = vadd.f32 1.0, %v1414_v16 }
 0x4f3   :  { %v1065_v19 = vadd.f32 1.0, %v1416_v20  ;;  %v1206_v20 = vld [vmem:[#allocation14] sm:$0xff] }
 0x4f4   :  { %1417 = vrcp.f32 %v1042_v49  ;;  %v1054_v46 = vand.u32 2147483648, %v1042_v49  ;;  %v1052_v14 = vand.u32 2147483647, %v1042_v49  ;;  %vm1048_vm5 = vweird.f32 %v1042_v49  ;;  %1241 = vmatpush.msra.mxu0 %v1206_v20 }
 0x4f5   :  { %1419 = vrcp.f32 %v1065_v19  ;;  %v1077_v57 = vand.u32 2147483648, %v1065_v19  ;;  %vm1071_vm8 = vweird.f32 %v1065_v19  ;;  %v1075_v36 = vand.u32 2147483647, %v1065_v19 }
 0x4f6   :  { %v1055_v56 = vor.u32 1.1754944e-38, %v1054_v46  ;;  %vm1053_vm7 = vcmp.eq.f32.partialorder %v1052_v14, 8.507059e+37  ;;  %v1197_v46 = vrot.slane %v2389_v8, 2 }
 0x4f7   :  { %v1078_v48 = vor.u32 1.1754944e-38, %v1077_v57  ;;  %vm1076_vm10 = vcmp.eq.f32.partialorder %v1075_v36, 8.507059e+37 }
 0x4fa   :  { %v1418_v58 = vpop.eup %1417 }
 0x4fb   :  { %v1420_v27 = vpop.eup %1419  ;;  %v1044_v39 = vmul.f32 %v1418_v58, %v1042_v49  ;;  %vm1049_vm4 = vweird.f32 %v1418_v58 }
 0x4fc   :  { %v1067_v35 = vmul.f32 %v1420_v27, %v1065_v19  ;;  %vm1050_vm6 = vmor %vm1048_vm5, %vm1049_vm4  ;;  %vm1072_vm0 = vweird.f32 %v1420_v27 }
 0x4fd   :  { %v1045_v60 = vsub.f32 1.0, %v1044_v39  ;;  %vm1073_vm9 = vmor %vm1071_vm8, %vm1072_vm0 }
 0x4fe   :  { %v1068_v28 = vsub.f32 1.0, %v1067_v35 }
 0x4ff   :  { %v1046_v37 = vmul.f32 %v1418_v58, %v1045_v60 }
 0x500   :  { %v1069_v13 = vmul.f32 %v1420_v27, %v1068_v28 }
 0x501   :  { %v1047_v26 = vadd.f32 %v1418_v58, %v1046_v37 }
 0x502   :  { %v1070_v25 = vadd.f32 %v1420_v27, %v1069_v13 }
 0x503   :  { %v1051_v40 = vsel %vm1050_vm6, %v1418_v58, %v1047_v26 }
 0x504   :  { %v1056_v59 = vsel %vm1053_vm7, %v1055_v56, %v1051_v40  ;;  %v1074_v42 = vsel %vm1073_vm9, %v1420_v27, %v1070_v25 }
 0x505   :  { %v1082_v54 = vmul.f32 %v1081_v2, %v1056_v59  ;;  %v1079_v0 = vsel %vm1076_vm10, %v1078_v48, %v1074_v42 }
 0x507   :  { %v1085_v63 = vadd.f32 %v1083_v12, %v1082_v54 }
 0x509   :  { %1421 = vtanh.f32 %v1085_v63 }
 0x50f   :  { %v1422_v45 = vpop.eup %1421 }
 0x510   :  { %v1087_v50 = vsub.f32 %v2369_v17, %v1422_v45 }
 0x512   :  { %v1088_v1 = vmul.f32 %v1087_v50, %v1079_v0  ;;  %v1352_v50 = vld [vmem:[#allocation15] ss:$0 sm:$0xff] }
 0x514   :  { %v2383_v3 = vadd.f32 %v1422_v45, %v1088_v1  ;;  %v2463_v45 = vlaneseq }
 0x516   :  { %1090 = vst [vmem:[#allocation3 + $0x6] sm:$0x1] %v2383_v3  ;;  %1107 = vmatmul.f32.vlgmr.msrb.gmra.mxu1 %v2383_v3  ;;  %1127 = vmatmul.f32.vlgmr.msrb.gmra.mxu2 %v2383_v3  ;;  %v1247_v48 = vand.u32 127, %v2463_v45 }
 0x517   :  { %1147 = vmatmul.f32.vlgmr.msrb.gmra.mxu3 %v2383_v3 }
 0x518   :  { %vm1248_vm4 = vcmp.lt.s32.totalorder %v1247_v48, 8 }
 0x593   :  { %v1108_v52 = vpop.f32.mrf.mxu1 }
 0x594   :  { %v1152_v53 = vadd.f32 %v2389_v8, %v1108_v52 }
 0x596   :  { %v1337_v44 = vmul.f32 -1.442695, %v1152_v53 }
 0x598   :  { %1423 = vpow2.f32 %v1337_v44 }
 0x599   :  { %v1128_v47 = vpop.f32.mrf.mxu2 }
 0x59a   :  { %v1175_v9 = vadd.f32 %v1173_v62, %v1128_v47  ;;  %v1148_v27 = vpop.f32.mrf.mxu3 }
 0x59b   :  { %v1195_v38 = vadd.f32 %v2365_v6, %v1148_v27 }
 0x59c   :  { %v1338_v11 = vmul.f32 -1.442695, %v1175_v9 }
 0x59e   :  { %v1424_v17 = vpop.eup %1423  ;;  %1425 = vpow2.f32 %v1338_v11 }
 0x59f   :  { %v1156_v21 = vadd.f32 1.0, %v1424_v17 }
 0x5a1   :  { %1427 = vrcp.f32 %v1156_v21  ;;  %v1168_v19 = vand.u32 2147483648, %v1156_v21  ;;  %v1166_v33 = vand.u32 2147483647, %v1156_v21  ;;  %vm1162_vm12 = vweird.f32 %v1156_v21 }
 0x5a3   :  { %v1169_v35 = vor.u32 1.1754944e-38, %v1168_v19  ;;  %vm1167_vm14 = vcmp.eq.f32.partialorder %v1166_v33, 8.507059e+37 }
 0x5a4   :  { %v1426_v51 = vpop.eup %1425 }
 0x5a5   :  { %v1179_v32 = vadd.f32 1.0, %v1426_v51 }
 0x5a7   :  { %v1428_v55 = vpop.eup %1427  ;;  %1429 = vrcp.f32 %v1179_v32  ;;  %v1191_v12 = vand.u32 2147483648, %v1179_v32  ;;  %vm1185_vm1 = vweird.f32 %v1179_v32  ;;  %v1189_v59 = vand.u32 2147483647, %v1179_v32 }
 0x5a8   :  { %v1158_v16 = vmul.f32 %v1428_v55, %v1156_v21  ;;  %vm1163_vm11 = vweird.f32 %v1428_v55 }
 0x5a9   :  { %vm1164_vm13 = vmor %vm1162_vm12, %vm1163_vm11  ;;  %v1192_v63 = vor.u32 1.1754944e-38, %v1191_v12  ;;  %vm1190_vm3 = vcmp.eq.f32.partialorder %v1189_v59, 8.507059e+37 }
 0x5aa   :  { %v1159_v49 = vsub.f32 1.0, %v1158_v16 }
 0x5ac   :  { %v1160_v29 = vmul.f32 %v1428_v55, %v1159_v49 }
 0x5ad   :  { %v1430_v58 = vpop.eup %1429 }
 0x5ae   :  { %v1181_v39 = vmul.f32 %v1430_v58, %v1179_v32  ;;  %v1161_v60 = vadd.f32 %v1428_v55, %v1160_v29  ;;  %vm1186_vm15 = vweird.f32 %v1430_v58 }
 0x5af   :  { %vm1187_vm2 = vmor %vm1185_vm1, %vm1186_vm15 }
 0x5b0   :  { %v1182_v37 = vsub.f32 1.0, %v1181_v39  ;;  %v1165_v14 = vsel %vm1164_vm13, %v1428_v55, %v1161_v60 }
 0x5b1   :  { %v1170_v26 = vsel %vm1167_vm14, %v1169_v35, %v1165_v14 }
 0x5b2   :  { %v1196_v56 = vmul.f32 %v1195_v38, %v1170_v26  ;;  %v1183_v28 = vmul.f32 %v1430_v58, %v1182_v37 }
 0x5b4   :  { %v1199_v2 = vadd.f32 %v1197_v46, %v1196_v56  ;;  %v1184_v40 = vadd.f32 %v1430_v58, %v1183_v28 }
 0x5b6   :  { %1431 = vtanh.f32 %v1199_v2  ;;  %v1188_v54 = vsel %vm1187_vm2, %v1430_v58, %v1184_v40 }
 0x5b7   :  { %v1193_v57 = vsel %vm1190_vm3, %v1192_v63, %v1188_v54 }
 0x5bc   :  { %v1432_v13 = vpop.eup %1431 }
 0x5bd   :  { %v1201_v25 = vsub.f32 %v2383_v3, %v1432_v13 }
 0x5bf   :  { %v1202_v36 = vmul.f32 %v1201_v25, %v1193_v57 }
 0x5c1   :  { %v1203_v6 = vadd.f32 %v1432_v13, %v1202_v36 }
 0x5c3   :  { %1204 = vst [vmem:[#allocation3 + $0x7] sm:$0x1] %v1203_v6 }
 0x5ca   :  { %v1205_v42 = vld [vmem:[#allocation3] sm:$0xff] }
 0x5cb   :  { %1242 = vmatmul.f32.vlgmr.msra.gmra.mxu0 %v1205_v42 }
 0x648   :  { %v1243_v0 = vpop.f32.mrf.mxu0 }
 0x649   :  { %v1244_v1 = vadd.f32 %v1352_v50, %v1243_v0 }
 0x64b   :  { %v1249_v4 = vsel %vm1248_vm4, %v1244_v1, -1e+30 }
 0x64c   :  { %1250 = vmax.xlane.f32.xlu0 %v1249_v4 }
 0x6bf   :  { %v1251_v5 = vpop.xlane.xlu0 %1250 }
 0x6c0   :  { %v1252_v7 = vsub.f32 %v1244_v1, %v1251_v5 }
 0x6c2   :  { %v1253_v8 = vmul.f32 1.442695, %v1252_v7 }
 0x6c4   :  { %1433 = vpow2.f32 %v1253_v8 }
 0x6ca   :  { %v1434_v61 = vpop.eup %1433 }
 0x6cb   :  { %v1255_v3 = vsel %vm1248_vm4, %v1434_v61, 0.0 }
 0x6cc   :  { %1256 = vadd.xlane.f32.xlu0 %v1255_v3 }
 0x73f   :  { %v1257_v52 = vpop.xlane.xlu0 %1256 }
 0x740   :  { %1435 = vlog2.f32 %v1257_v52 }
 0x746   :  { %v1436_v53 = vpop.eup %1435 }
 0x747   :  { %v1259_v41 = vmul.f32 0.6931472, %v1436_v53 }
 0x749   :  { %v1260_v44 = vadd.f32 %v1259_v41, %v1251_v5 }
 0x74b   :  { %v1261_v62 = vsub.f32 %v1244_v1, %v1260_v44 }
 0x74d   :  { %1262 = vst [vmem:[#allocation17] sm:$0xff] %v1261_v62 }
 0x74e   :  { %1273 = dma.vmem_to_hbm [thread:$0]  %s1269_s25, 128, %s1271_s27, [#allocation6]  }
 0x74f   :  { %1677 = dma.done.wait [#allocation6], 128  }
 0x750   :  { %1678 = vsyncadd [#allocation6], 4294967168 }
 0x751   :  { %1278 = vsyncpa [#allocation5], 1 }
 0x752   :  { %1279 = vsyncpa [#allocation10], 1 }
 0x753   :  { %1280 = vsyncpa [#allocation13], 1 }
 0x754   :  { %1281 = vsyncpa [#allocation16], 1 }
 0x755   :  { %1282 = vsyncpa [#allocation6], 1 }
 0x756   :  { %1283 = vsyncpa [#allocation7], 1 }

</bundles_post_ra>
